<compile_context>
chip_gen: v6e
topology: v6e:2x2x1
jax: 0.10.0
libtpu: 0.0.40
codegen_flags: <defaults>
</compile_context>

<pallas_src>
import jax
import jax.numpy as jnp
from jax.experimental import pallas as pl
from jax.experimental.pallas import tpu as pltpu


def self_attn_kernel(xq_ref, kk_ref, eb_ref, v_ref, gamma_ref, out_ref, attn_ref):
    # xq_ref:   (1, TQ, C)  query tile of x, pixel-major (delivered by BlockSpec)
    # kk_ref:   (1, C, N)   (Wq Wk^T) @ x   (folded key projection, per batch)
    # eb_ref:   (1, 1, N)   (bq Wk^T) @ x   (column-varying bias term)
    # v_ref:    (1, N, C)   value tensor x Wv + bv, pixel-major
    # gamma_ref:(1, 1)      residual scale, SMEM scalar
    # out_ref:  (1, TQ, C)  output tile, pixel-major
    # attn_ref: (1, TQ, N)  attention tile (lane-dense store, last dim N)
    xq = xq_ref[0].astype(jnp.float32)        # (TQ, C)
    kk = kk_ref[0]                            # (C, N)  f32
    eb = eb_ref[0]                            # (1, N)  f32
    v = v_ref[0]                              # (N, C)  f32

    # energy[i, j] = sum_c xq[i, c] * kk[c, j] + eb[0, j]
    # (softmax-equivalent to the original Q K^T energy; row-constant terms dropped)
    # bf16 MXU operands, f32 accumulation: single-pass MXU, K=C=32 contraction.
    energy = jnp.dot(xq.astype(jnp.bfloat16), kk.astype(jnp.bfloat16),
                     preferred_element_type=jnp.float32)                # (TQ, N)
    energy = energy + eb

    # Row softmax over the full (resident) key axis — all f32 (v5e-safe).
    m = jnp.max(energy, axis=-1, keepdims=True)
    p = jnp.exp(energy - m)
    s = jnp.sum(p, axis=-1, keepdims=True)
    inv = pl.reciprocal(s, approx=True)       # EUP slot
    inv = inv * (2.0 - s * inv)               # one Newton step -> f32-exact rows
    attn = p * inv                            # (TQ, N)
    attn_ref[0] = attn.astype(attn_ref.dtype)

    # out[i, c] = sum_j attn[i, j] * v[j, c]   (== torch.bmm(V, attn^T), pixel-major)
    # Canonical orientation: contraction on attn's lane axis / v's sublane axis,
    # so no XLU transpose of the big attention tile is needed.
    out_nc = jnp.dot(attn.astype(jnp.bfloat16), v.astype(jnp.bfloat16),
                     preferred_element_type=jnp.float32)                # (TQ, C)

    gamma = gamma_ref[0, 0]
    out_ref[0] = (gamma * out_nc + xq).astype(out_ref.dtype)


def _vmem_capacity_bytes():
    try:
        return int(pltpu.get_tpu_info().vmem_capacity_bytes)
    except Exception:
        return 64 << 20   # v7x per-TC size: the most conservative modern target


def _vmem_live_bytes(tq, n, c, attn_bytes):
    """Rough per-step VMEM live-set estimate (double-buffered I/O + temporaries)."""
    b = 0
    b += 2 * tq * n * attn_bytes          # attn output tile, double buffered
    b += 2 * tq * n * 4                   # energy / p f32 temporaries
    b += tq * n * 2                       # bf16 copy of attn for the second matmul
    b += 2 * (tq * c + c * n + n + n * c + tq * c) * 4   # xq, kk, eb, v, out (x2 buffers)
    b += 2 << 20                          # slack for compiler scratch / spills
    return b


def _pick_tiling(n, c, attn_bytes):
    """VMEM-budget-aware query-tile size + explicit vmem limit."""
    cap = _vmem_capacity_bytes()
    limit = min((cap * 3) // 4, 96 << 20)         # 48 MiB on v7x, 96 MiB on v5e/v6e
    budget = int(limit * 0.85)
    if n <= 1024:
        # Small spatial sizes: one query tile per batch; per-step work >> step overhead.
        return n, limit
    tq = None
    for cand in (1024, 512, 256, 128):
        if n % cand == 0 and _vmem_live_bytes(cand, n, c, attn_bytes) <= budget:
            tq = cand
            break
    if tq is None:
        # TODO(synk): for very large N a flash-style key-tiled variant (no resident
        # (TQ,N) row) would be needed; fall back to the smallest aligned tile.
        tq = 128 if n % 128 == 0 else n
    return tq, limit


def self_attn(x, wq, bq, wk, bk, wv, bv, gamma, attn_dtype=jnp.float32):
    """x: (B, C, W, H) NCHW.  Weights in 'x @ W' orientation: wq/wk: (C, C//8), wv: (C, C).
       bq/bk: (1, C//8), bv: (1, C), gamma: (1, 1).
       attn_dtype=jnp.bfloat16 halves the dominant (B,N,N) HBM writeback if callers
       don't need f32 attention."""
    B, C, W, H = x.shape
    N = W * H
    attn_bytes = jnp.dtype(attn_dtype).itemsize

    xf = x.astype(jnp.float32)
    x_cn = xf.reshape(B, C, N)                       # channel-major (free reshape)
    x_nc = jnp.transpose(x_cn, (0, 2, 1))            # pixel-major (B, N, C) — tiny tensor

    # Fold the query/key projections (softmax-equivalent, see kernel docstring) and
    # precompute per-batch K-side / V-side tensors with tiny XLA matmuls (K = C = 32),
    # so the kernel never redoes this work per query tile.
    wqk = (wq @ wk.T).astype(jnp.float32)            # (C, C)
    bqk = (bq @ wk.T).astype(jnp.float32)            # (1, C)
    kk = jnp.einsum("cd,bdn->bcn", wqk, x_cn)        # (B, C, N)
    eb = jnp.einsum("od,bdn->bon", bqk, x_cn)        # (B, 1, N)
    v_nc = jnp.einsum("bnd,dc->bnc", x_nc, wv.astype(jnp.float32)) \
        + bv.astype(jnp.float32)                     # (B, N, C)

    tq, vmem_limit = _pick_tiling(N, C, attn_bytes)
    grid = (B, N // tq)

    cost = pl.CostEstimate(
        flops=4 * B * N * N * C,                     # two (N x N x C)-ish matmuls per batch
        transcendentals=B * N * N,                   # exp
        bytes_accessed=B * N * N * attn_bytes + 16 * B * N * C * 4,
    )

    out_nc, attn = pl.pallas_call(
        self_attn_kernel,
        out_shape=(
            jax.ShapeDtypeStruct((B, N, C), x.dtype),
            jax.ShapeDtypeStruct((B, N, N), attn_dtype),
        ),
        grid=grid,
        in_specs=[
            pl.BlockSpec((1, tq, C), lambda b, qi: (b, qi, 0)),      # query tile of x
            pl.BlockSpec((1, C, N), lambda b, qi: (b, 0, 0)),        # kk (per-batch, no re-DMA over qi)
            pl.BlockSpec((1, 1, N), lambda b, qi: (b, 0, 0)),        # e_bias
            pl.BlockSpec((1, N, C), lambda b, qi: (b, 0, 0)),        # v (pixel-major)
            pl.BlockSpec(memory_space=pltpu.MemorySpace.SMEM),       # gamma scalar
        ],
        out_specs=(
            pl.BlockSpec((1, tq, C), lambda b, qi: (b, qi, 0)),      # out tile (tiny)
            pl.BlockSpec((1, tq, N), lambda b, qi: (b, qi, 0)),      # attn tile (lane dim = N)
        ),
        compiler_params=pltpu.CompilerParams(
            dimension_semantics=("parallel", "parallel"),
            vmem_limit_bytes=int(vmem_limit),
        ),
        cost_estimate=cost,
    )(x_nc, kk, eb, v_nc, gamma)

    # Tiny (B*C*N) transpose back to NCHW; the big (B,N,N) tensor needs no relayout.
    out = jnp.transpose(out_nc.reshape(B, W, H, C), (0, 3, 1, 2))
    return out, attn


def reference(x, wq, bq, wk, bk, wv, bv, gamma):
    """Pure-JAX reference mirroring the PyTorch forward exactly (all bias terms kept)."""
    B, C, W, H = x.shape
    N = W * H
    xf = jnp.transpose(x, (0, 2, 3, 1)).reshape(B, N, C).astype(jnp.float32)
    q = xf @ wq + bq
    k = xf @ wk + bk
    v = xf @ wv + bv
    energy = jnp.einsum("bnc,bmc->bnm", q, k)
    attn = jax.nn.softmax(energy, axis=-1)
    out = jnp.einsum("bnm,bmc->bnc", attn, v)
    out = gamma[0, 0] * out + xf
    out = jnp.transpose(out.reshape(B, W, H, C), (0, 3, 1, 2)).astype(x.dtype)
    return out, attn


if __name__ == "__main__":
    # Small shapes consistent with the module: in_dim C=32 (so C//8=4), 16x16 spatial.
    B, C, W, H = 2, 32, 16, 16
    Cq = C // 8

    key = jax.random.PRNGKey(0)
    kx, kq, kbq, kk_, kbk, kv, kbv = jax.random.split(key, 7)

    x = jax.random.normal(kx, (B, C, W, H), dtype=jnp.float32)

    # Deterministic synthetic parameters (1x1 conv weights folded to matmul orientation).
    scale = 0.1
    wq = scale * jax.random.normal(kq, (C, Cq), dtype=jnp.float32)
    bq = scale * jax.random.normal(kbq, (1, Cq), dtype=jnp.float32)
    wk = scale * jax.random.normal(kk_, (C, Cq), dtype=jnp.float32)
    bk = scale * jax.random.normal(kbk, (1, Cq), dtype=jnp.float32)
    wv = scale * jax.random.normal(kv, (C, C), dtype=jnp.float32)
    bv = scale * jax.random.normal(kbv, (1, C), dtype=jnp.float32)
    # Module __init__ sets gamma = 0 (out would equal x); use a nonzero value so the
    # residual-scale path is actually exercised.
    gamma = jnp.array([[0.5]], dtype=jnp.float32)

    out, attn = jax.jit(self_attn)(x, wq, bq, wk, bk, wv, bv, gamma)
    (out, attn) = jax.block_until_ready((out, attn))

    out_ref, attn_ref = reference(x, wq, bq, wk, bk, wv, bv, gamma)
    assert out.shape == (B, C, W, H) and attn.shape == (B, W * H, W * H)
    # Tolerances account for bf16 MXU operands (f32 accumulation) in both matmuls.
    assert jnp.allclose(attn, attn_ref, atol=1e-3, rtol=1e-2), "attention mismatch"
    assert jnp.allclose(out, out_ref, atol=5e-3, rtol=5e-3), "output mismatch"

    print("KERNEL_OK")
</pallas_src>

<mosaic_0001>
module attributes {stable_mosaic.version = 11 : i64} {
  func.func @self_attn_kernel(%arg0: i32, %arg1: i32, %arg2: memref<1x256x32xf32, #tpu.memory_space<vmem>>, %arg3: memref<1x32x256xf32, #tpu.memory_space<vmem>>, %arg4: memref<1x1x256xf32, #tpu.memory_space<vmem>>, %arg5: memref<1x256x32xf32, #tpu.memory_space<vmem>>, %arg6: memref<1x1xf32, #tpu.memory_space<smem>>, %arg7: memref<1x256x32xf32, #tpu.memory_space<vmem>>, %arg8: memref<1x256x256xf32, #tpu.memory_space<vmem>>) attributes {dimension_semantics = [#tpu.dimension_semantics<parallel>, #tpu.dimension_semantics<parallel>], iteration_bounds = array<i64: 2, 1>, scalar_prefetch = 0 : i64, scratch_operands = 0 : i64, tpu.core_type = #tpu.core_type<tc>, window_params = [{transform_indices = @transform_0, window_bounds = array<i64: 1, 256, 32>}, {transform_indices = @transform_1, window_bounds = array<i64: 1, 32, 256>}, {transform_indices = @transform_2, window_bounds = array<i64: 1, 1, 256>}, {transform_indices = @transform_3, window_bounds = array<i64: 1, 256, 32>}, {transform_indices = @transform_4, window_bounds = array<i64: 1, 1>}, {transform_indices = @transform_5, window_bounds = array<i64: 1, 256, 32>}, {transform_indices = @transform_6, window_bounds = array<i64: 1, 256, 256>}]} {
    %c0 = arith.constant 0 : index
    %c0_0 = arith.constant 0 : index
    %c0_1 = arith.constant 0 : index
    %0 = vector.load %arg2[%c0, %c0_0, %c0_1] : memref<1x256x32xf32, #tpu.memory_space<vmem>>, vector<1x256x32xf32>
    %1 = vector.shape_cast %0 : vector<1x256x32xf32> to vector<256x32xf32>
    %c0_2 = arith.constant 0 : index
    %c0_3 = arith.constant 0 : index
    %c0_4 = arith.constant 0 : index
    %2 = vector.load %arg3[%c0_2, %c0_3, %c0_4] : memref<1x32x256xf32, #tpu.memory_space<vmem>>, vector<1x32x256xf32>
    %3 = vector.shape_cast %2 : vector<1x32x256xf32> to vector<32x256xf32>
    %c0_5 = arith.constant 0 : index
    %c0_6 = arith.constant 0 : index
    %c0_7 = arith.constant 0 : index
    %4 = vector.load %arg4[%c0_5, %c0_6, %c0_7] : memref<1x1x256xf32, #tpu.memory_space<vmem>>, vector<1x1x256xf32>
    %5 = vector.shape_cast %4 : vector<1x1x256xf32> to vector<1x256xf32>
    %c0_8 = arith.constant 0 : index
    %c0_9 = arith.constant 0 : index
    %c0_10 = arith.constant 0 : index
    %6 = vector.load %arg5[%c0_8, %c0_9, %c0_10] : memref<1x256x32xf32, #tpu.memory_space<vmem>>, vector<1x256x32xf32>
    %7 = vector.shape_cast %6 : vector<1x256x32xf32> to vector<256x32xf32>
    %8 = arith.truncf %1 : vector<256x32xf32> to vector<256x32xbf16>
    %9 = arith.truncf %3 : vector<32x256xf32> to vector<32x256xbf16>
    %cst = arith.constant dense<0.000000e+00> : vector<256x256xf32>
    %10 = tpu.matmul %8, %9, %cst {dimension_numbers = #tpu.dot_dimension_numbers<[1], [0], [0], [1], [0, 0, 1, 1], [], []>} : vector<256x32xbf16>, vector<32x256xbf16>, vector<256x256xf32> -> vector<256x256xf32>
    %11 = vector.broadcast %5 : vector<1x256xf32> to vector<256x256xf32>
    %12 = arith.addf %10, %11 : vector<256x256xf32>
    %cst_11 = arith.constant dense<0xFF800000> : vector<256xf32>
    %13 = vector.multi_reduction <maximumf>, %12, %cst_11 [1] : vector<256x256xf32> to vector<256xf32>
    %14 = vector.shape_cast %13 : vector<256xf32> to vector<256x1xf32>
    %15 = vector.broadcast %14 : vector<256x1xf32> to vector<256x256xf32>
    %16 = arith.subf %12, %15 : vector<256x256xf32>
    %17 = math.exp %16 : vector<256x256xf32>
    %cst_12 = arith.constant dense<0.000000e+00> : vector<256xf32>
    %18 = vector.multi_reduction <add>, %17, %cst_12 [1] : vector<256x256xf32> to vector<256xf32>
    %19 = vector.shape_cast %18 : vector<256xf32> to vector<256x1xf32>
    %20 = tpu.reciprocal %19 {approx = true} : vector<256x1xf32> -> vector<256x1xf32>
    %21 = arith.mulf %19, %20 : vector<256x1xf32>
    %cst_13 = arith.constant 2.000000e+00 : f32
    %22 = vector.broadcast %cst_13 : f32 to vector<256x1xf32>
    %23 = arith.subf %22, %21 : vector<256x1xf32>
    %24 = arith.mulf %20, %23 : vector<256x1xf32>
    %25 = vector.broadcast %24 : vector<256x1xf32> to vector<256x256xf32>
    %26 = arith.mulf %17, %25 : vector<256x256xf32>
    %c0_14 = arith.constant 0 : index
    %c0_15 = arith.constant 0 : index
    %c0_16 = arith.constant 0 : index
    %27 = vector.load %arg8[%c0_14, %c0_15, %c0_16] : memref<1x256x256xf32, #tpu.memory_space<vmem>>, vector<1x256x256xf32>
    %28 = vector.shape_cast %27 : vector<1x256x256xf32> to vector<256x256xf32>
    %29 = vector.shape_cast %26 : vector<256x256xf32> to vector<1x256x256xf32>
    tpu.vector_store %arg8[%c0_14, %c0_15, %c0_16], %29 {strides = array<i32>} : memref<1x256x256xf32, #tpu.memory_space<vmem>>, vector<1x256x256xf32>,
    %30 = arith.truncf %26 : vector<256x256xf32> to vector<256x256xbf16>
    %31 = arith.truncf %7 : vector<256x32xf32> to vector<256x32xbf16>
    %cst_17 = arith.constant dense<0.000000e+00> : vector<256x32xf32>
    %32 = tpu.matmul %30, %31, %cst_17 {dimension_numbers = #tpu.dot_dimension_numbers<[1], [0], [0], [1], [0, 0, 1, 1], [], []>} : vector<256x256xbf16>, vector<256x32xbf16>, vector<256x32xf32> -> vector<256x32xf32>
    %c0_18 = arith.constant 0 : index
    %c0_19 = arith.constant 0 : index
    %33 = memref.load %arg6[%c0_18, %c0_19] : memref<1x1xf32, #tpu.memory_space<smem>>
    %34 = vector.broadcast %33 : f32 to vector<256x32xf32>
    %35 = arith.mulf %34, %32 : vector<256x32xf32>
    %36 = arith.addf %35, %1 : vector<256x32xf32>
    %c0_20 = arith.constant 0 : index
    %c0_21 = arith.constant 0 : index
    %c0_22 = arith.constant 0 : index
    %37 = vector.load %arg7[%c0_20, %c0_21, %c0_22] : memref<1x256x32xf32, #tpu.memory_space<vmem>>, vector<1x256x32xf32>
    %38 = vector.shape_cast %37 : vector<1x256x32xf32> to vector<256x32xf32>
    %39 = vector.shape_cast %36 : vector<256x32xf32> to vector<1x256x32xf32>
    tpu.vector_store %arg7[%c0_20, %c0_21, %c0_22], %39 {strides = array<i32>} : memref<1x256x32xf32, #tpu.memory_space<vmem>>, vector<1x256x32xf32>,
    return
  }
  func.func @transform_0(%arg0: i32, %arg1: i32) -> (i32, i32, i32) {
    %c0_i32 = arith.constant 0 : i32
    %c0_i32_0 = arith.constant 0 : i32
    return %arg0, %arg1, %c0_i32 : i32, i32, i32
  }
  func.func @transform_1(%arg0: i32, %arg1: i32) -> (i32, i32, i32) {
    %c0_i32 = arith.constant 0 : i32
    %c0_i32_0 = arith.constant 0 : i32
    %c0_i32_1 = arith.constant 0 : i32
    return %arg0, %c0_i32, %c0_i32_0 : i32, i32, i32
  }
  func.func @transform_2(%arg0: i32, %arg1: i32) -> (i32, i32, i32) {
    %c0_i32 = arith.constant 0 : i32
    %c0_i32_0 = arith.constant 0 : i32
    %c0_i32_1 = arith.constant 0 : i32
    return %arg0, %c0_i32, %c0_i32_0 : i32, i32, i32
  }
  func.func @transform_3(%arg0: i32, %arg1: i32) -> (i32, i32, i32) {
    %c0_i32 = arith.constant 0 : i32
    %c0_i32_0 = arith.constant 0 : i32
    %c0_i32_1 = arith.constant 0 : i32
    return %arg0, %c0_i32, %c0_i32_0 : i32, i32, i32
  }
  func.func @transform_4(%arg0: i32, %arg1: i32) -> (i32, i32) {
    %c0_i32 = arith.constant 0 : i32
    %c0_i32_0 = arith.constant 0 : i32
    %c0_i32_1 = arith.constant 0 : i32
    return %c0_i32, %c0_i32_0 : i32, i32
  }
  func.func @transform_5(%arg0: i32, %arg1: i32) -> (i32, i32, i32) {
    %c0_i32 = arith.constant 0 : i32
    %c0_i32_0 = arith.constant 0 : i32
    return %arg0, %arg1, %c0_i32 : i32, i32, i32
  }
  func.func @transform_6(%arg0: i32, %arg1: i32) -> (i32, i32, i32) {
    %c0_i32 = arith.constant 0 : i32
    %c0_i32_0 = arith.constant 0 : i32
    return %arg0, %arg1, %c0_i32 : i32, i32, i32
  }
}

</mosaic_0001>

<bundles_post_ra>
// kernel: self_attn.1
= control target key start
LH: loop header
LB: loop body
LE: loop exit
PB: predicated region body
PF: predicated region fallthrough
CT: control target
= control target key end

     0   :  { %s3529_s0 = inlined_call_operand.vmem [shape: f32[2,256,32], index: 0, kind: input, shape index: {}]   ;;  %s3530_s1 = inlined_call_operand.vmem [shape: f32[2,32,256], index: 1, kind: input, shape index: {}]   ;;  %s3531_s2 = inlined_call_operand.vmem [shape: f32[2,1,256], index: 2, kind: input, shape index: {}]   ;;  %s3532_s3 = inlined_call_operand.vmem [shape: f32[2,256,32], index: 3, kind: input, shape index: {}]   ;;  %s3533_s4 = inlined_call_operand.<no memory space> [shape: f32[1,1], index: 4, kind: input, shape index: {}]   ;;  %s3534_s5 = inlined_call_operand.hbm [shape: f32[2,256,32], index: 5, kind: output, shape index: {0}]   ;;  %s3535_s6 = inlined_call_operand.hbm [shape: f32[2,256,256], index: 6, kind: output, shape index: {1}]  }
   0x1   :  { %12 = sst [smem:[#allocation2]] %s3533_s4 }
   0x2   :  { %13 = vsyncpa [#allocation4], 0 }
   0x3   :  { %15 = vsyncpa [#allocation4 + $0x1], 0 }
   0x4   :  { %16 = vsyncpa [#allocation6], 0 }
   0x5   :  { %18 = vsyncpa [#allocation6 + $0x1], 0  ;;  %s2450_s23 = smov 0   ;;  %s2452_s24 = smov 0  }
   0x6   :  { %s2454_s25 = smov 0   ;;  %s2456_s26 = smov 0  }
   0x7   :  { %s2458_s27 = smov 0   ;;  %s2460_s28 = smov 0  }
   0x8 LB: > { %s1837_s4 = sadd.s32 4294967295, %s2403_s28   ;;  %s1838_s29 = sadd.s32 4294967294, %s2403_s28   ;;  %s2403_s28 = sphi %s2460_s28, %s24_s28   ;;  %s2399_s27 = sphi %s2458_s27, %s3611_s27   ;;  %s2395_s26 = sphi %s2456_s26, %s3610_s26   ;;  %s2391_s25 = sphi %s2454_s25, %s3609_s25   ;;  %s2387_s24 = sphi %s2452_s24, %s3608_s24   ;;  %s2383_s23 = sphi %s2450_s23, %s3607_s23  }
   0x9   : > { %s36_s30 = sadd.s32 1, %s2399_s27  ;;  %s172_s7 = sadd.s32 1, %s2391_s25 }
   0xa   : > { %p38_p0 = scmp.ge.s32.totalorder %s36_s30, 2  ;;  %p182_p1 = scmp.ne.s32.totalorder %s2391_s25, %s2387_s24 }
   0xb   : > { %p183_p2 = scmp.eq.s32.totalorder %s1837_s4, 1  ;;  %p188_p3 = scmp.ne.s32.totalorder %s2387_s24, %s2383_s23 }
   0xc   : > { %s3613_s30 = smov (%p38_p0, %s36_s30), 0  ;;  %p189_p5 = scmp.eq.s32.totalorder %s1838_s29, 1 }
   0xd   : > { %p2490_p4 = por %p183_p2, %p182_p1  ;;  %s167_s9 = ssub.s32 %s2399_s27, %s3613_s30 }
   0xe   : > { %p1841_p6 = scmp.ge.s32.totalorder %s2403_s28, 1  ;;  %p170_p7 = scmp.eq.s32.totalorder %s167_s9, 0 }
   0xf   : > { %p2497_p8 = por %p189_p5, %p188_p3  ;;  %p274_p9 = scmp.lt.s32.totalorder %s2403_s28, 3 }
  0x10   : > { %s2503_s11 = scalar_select %p170_p7, %s2391_s25, %s172_s7  }
  0x11   : > { %p275_p10 = pnand %p1841_p6, %p274_p9 }
  0x13   : > { %278 = sbr.rel (%p275_p10) target bundleno = 972 (0x3cc), region = 40 }
  0x18   : > { %p328_p11 = scmp.lt.s32.totalorder %s2395_s26, 1  ;;  %v2405_v0 = vmov 0   ;;  %vm458_vm0 = vcmask 261120   ;;  %v448_v61 = vlaneseq  ;;  %s1549_s16 = sld [smem:[#allocation2]] }
  0x19   : > { %539 = vmatprep.mubr.bf16.mxu0 %v2405_v0  ;;  %s1879_s19 = sshll.u32 %s2395_s26, 13 }
  0x1a   : > { %s2508_s12 = scalar_select %p328_p11, %s2395_s26, 1  ;;  %v449_v63 = vshrl.u32 %v448_v61, 7 }
  0x1c   : > { %s1875_s13 = sshll.u32 %s2508_s12, 8  ;;  %s1876_s14 = sshll.u32 %s2508_s12, 6 }
  0x1d   : > { %s341_s17 = scalar_lea.vmem %s3530_s1, %s1876_s14  ;;  %s2520_s20 = scalar_lea.vmem %s3529_s0, %s1875_s13 }
  0x1e   : > { %v391_v1 = vld [vmem:[%s341_s17 + $0x28] sm:$0xff]  ;;  %v393_v2 = vld [vmem:[%s341_s17 + $0x38] sm:$0xff]  ;;  %v390_v3 = vld [vmem:[%s341_s17 + $0x20] sm:$0xff]  ;;  %s1848_s21 = sshll.u32 %s2508_s12, 1  ;;  %s2814_s14 = scalar_lea.vmem %s3532_s3, %s1875_s13 }
  0x1f   : > { %v446_v4 = vpack.c.bf16 %v393_v2, %v391_v1  ;;  %v392_v5 = vld [vmem:[%s341_s17 + $0x30] sm:$0xff]  ;;  %v387_v6 = vld [vmem:[%s341_s17 + $0x8] sm:$0xff]  ;;  %v389_v7 = vld [vmem:[%s341_s17 + $0x18] sm:$0xff]  ;;  %s345_s29 = scalar_lea.vmem %s3531_s2, %s1848_s21  ;;  %s3118_s12 = sand.u32 1, %s2387_s24  }
  0x20   : > { %v445_v8 = vpack.c.bf16 %v392_v5, %v390_v3  ;;  %v444_v9 = vpack.c.bf16 %v389_v7, %v387_v6  ;;  %v386_v10 = vld [vmem:[%s341_s17] sm:$0xff]  ;;  %v388_v11 = vld [vmem:[%s341_s17 + $0x10] sm:$0xff]  ;;  %v355_v14 = vld [vmem:[%s2520_s20 + $0x8] sm:$0xff]  ;;  %v450_v3 = vsub.s32 0, %v449_v63  ;;  %s1843_s13 = sshll.u32 %s3118_s12, 9  ;;  %s1842_s17 = sshll.u32 %s3118_s12, 8 }
  0x21   : > { %519 = vmatprep.subr.bf16.mxu0 %v446_v4  ;;  %v443_v12 = vpack.c.bf16 %v388_v11, %v386_v10  ;;  %v354_v13 = vld [vmem:[%s2520_s20] sm:$0xff]  ;;  %v356_v16 = vld [vmem:[%s2520_s20 + $0x10] sm:$0xff]  ;;  %v357_v17 = vld [vmem:[%s2520_s20 + $0x18] sm:$0xff]  ;;  %s3141_s15 = scalar_lea.vmem [#allocation5], %s1843_s13  ;;  %s3315_s18 = scalar_lea.vmem [#allocation3], %s1842_s17 }
  0x22   : > { %520 = vmatpush1.bf16.msra.mxu0 %v445_v8  ;;  %v427_v15 = vpack.c.bf16 %v355_v14, %v354_v13  ;;  %v428_v18 = vpack.c.bf16 %v357_v17, %v356_v16  ;;  %v358_v19 = vld [vmem:[%s2520_s20 + $0x20] sm:$0xff]  ;;  %v359_v20 = vld [vmem:[%s2520_s20 + $0x28] sm:$0xff]  ;;  %v360_v22 = vld [vmem:[%s2520_s20 + $0x30] sm:$0xff]  ;;  %s1687_s21 = sshll.u32 %s3141_s15, 4  ;;  %s1653_s7 = scalar_lea.sflag [#allocation6], %s3118_s12  ;;  %s3384_s21 = int_to_ptr.vmem [resolvable:$true] %s1687_s21 }
  0x23   : > { %521 = vmatprep.subr.bf16.mxu0 %v444_v9  ;;  %v429_v21 = vpack.c.bf16 %v359_v20, %v358_v19  ;;  %v361_v23 = vld [vmem:[%s2520_s20 + $0x38] sm:$0xff]  ;;  %v362_v25 = vld [vmem:[%s2520_s20 + $0x40] sm:$0xff]  ;;  %v363_v26 = vld [vmem:[%s2520_s20 + $0x48] sm:$0xff]  ;;  %s2297_s9 = scalar_lea.vmem %s3384_s21, 8192 }
  0x24   : > { %v430_v24 = vpack.c.bf16 %v361_v23, %v360_v22  ;;  %v431_v27 = vpack.c.bf16 %v363_v26, %v362_v25  ;;  %v364_v28 = vld [vmem:[%s2520_s20 + $0x50] sm:$0xff]  ;;  %v365_v29 = vld [vmem:[%s2520_s20 + $0x58] sm:$0xff]  ;;  %v366_v31 = vld [vmem:[%s2520_s20 + $0x60] sm:$0xff]  ;;  %p2298_p12 = scmp.ne.s32.totalorder %s3384_s21, %s2297_s9 }
  0x25   : > { %v432_v30 = vpack.c.bf16 %v365_v29, %v364_v28  ;;  %v367_v32 = vld [vmem:[%s2520_s20 + $0x68] sm:$0xff]  ;;  %v368_v34 = vld [vmem:[%s2520_s20 + $0x70] sm:$0xff]  ;;  %v369_v35 = vld [vmem:[%s2520_s20 + $0x78] sm:$0xff] }
  0x26   : > { %522 = vmatpush1.bf16.msra.mxu0 %v443_v12  ;;  %v433_v33 = vpack.c.bf16 %v367_v32, %v366_v31  ;;  %v434_v36 = vpack.c.bf16 %v369_v35, %v368_v34  ;;  %v370_v37 = vld [vmem:[%s2520_s20 + $0x80] sm:$0xff]  ;;  %v371_v38 = vld [vmem:[%s2520_s20 + $0x88] sm:$0xff]  ;;  %v372_v40 = vld [vmem:[%s2520_s20 + $0x90] sm:$0xff]  ;;  %p2299_p13 = pnand %p2298_p12, %p2490_p4 }
  0x27   : > { %v435_v39 = vpack.c.bf16 %v371_v38, %v370_v37  ;;  %v373_v41 = vld [vmem:[%s2520_s20 + $0x98] sm:$0xff]  ;;  %v374_v43 = vld [vmem:[%s2520_s20 + $0xa0] sm:$0xff]  ;;  %v375_v44 = vld [vmem:[%s2520_s20 + $0xa8] sm:$0xff] }
  0x28   : > { %v436_v42 = vpack.c.bf16 %v373_v41, %v372_v40  ;;  %v437_v45 = vpack.c.bf16 %v375_v44, %v374_v43  ;;  %v376_v46 = vld [vmem:[%s2520_s20 + $0xb0] sm:$0xff]  ;;  %v377_v47 = vld [vmem:[%s2520_s20 + $0xb8] sm:$0xff]  ;;  %v378_v49 = vld [vmem:[%s2520_s20 + $0xc0] sm:$0xff]  ;;  %p2300_p0 = pneg %p2299_p13 }
  0x29   : > { %1851 = vmatmul.mubr.msk.bf16.vlgmr.msra.gmra.mxu0 %vm458_vm0, %v427_v15  ;;  %v438_v48 = vpack.c.bf16 %v377_v47, %v376_v46  ;;  %v379_v50 = vld [vmem:[%s2520_s20 + $0xc8] sm:$0xff]  ;;  %v380_v52 = vld [vmem:[%s2520_s20 + $0xd0] sm:$0xff]  ;;  %v381_v53 = vld [vmem:[%s2520_s20 + $0xd8] sm:$0xff] }
  0x2a   : > { %549 = vmatprep.mubr.bf16.mxu0 %v2405_v0  ;;  %v439_v51 = vpack.c.bf16 %v379_v50, %v378_v49  ;;  %v440_v54 = vpack.c.bf16 %v381_v53, %v380_v52  ;;  %v382_v55 = vld [vmem:[%s2520_s20 + $0xe0] sm:$0xff]  ;;  %v383_v56 = vld [vmem:[%s2520_s20 + $0xe8] sm:$0xff]  ;;  %v384_v58 = vld [vmem:[%s2520_s20 + $0xf0] sm:$0xff] }
  0x2b   : > { %v441_v57 = vpack.c.bf16 %v383_v56, %v382_v55  ;;  %v385_v59 = vld [vmem:[%s2520_s20 + $0xf8] sm:$0xff]  ;;  %v394_v4 = vld [vmem:[%s345_s29] sm:$0x3]  ;;  %s3382_s29 = scalar_lea.hbm %s3535_s6, %s1879_s19 }
  0x2c   : > { %v442_v60 = vpack.c.bf16 %v385_v59, %v384_v58  ;;  %v2597_v7 = vrot.slane %v394_v4, %v450_v3 }
  0x31   : > { %1852 = vmatmul.mubr.msk.bf16.gmra.mxu0 %vm458_vm0, %v428_v18 }
  0x32   : > { %559 = vmatprep.mubr.bf16.mxu0 %v2405_v0 }
  0x39   : > { %1853 = vmatmul.mubr.msk.bf16.gmra.mxu0 %vm458_vm0, %v429_v21 }
  0x3a   : > { %569 = vmatprep.mubr.bf16.mxu0 %v2405_v0 }
  0x41   : > { %1854 = vmatmul.mubr.msk.bf16.gmra.mxu0 %vm458_vm0, %v430_v24 }
  0x42   : > { %579 = vmatprep.mubr.bf16.mxu0 %v2405_v0 }
  0x49   : > { %1855 = vmatmul.mubr.msk.bf16.gmra.mxu0 %vm458_vm0, %v431_v27 }
  0x4a   : > { %589 = vmatprep.mubr.bf16.mxu0 %v2405_v0 }
  0x51   : > { %1856 = vmatmul.mubr.msk.bf16.gmra.mxu0 %vm458_vm0, %v432_v30 }
  0x52   : > { %599 = vmatprep.mubr.bf16.mxu0 %v2405_v0 }
  0x59   : > { %1857 = vmatmul.mubr.msk.bf16.gmra.mxu0 %vm458_vm0, %v433_v33 }
  0x5a   : > { %609 = vmatprep.mubr.bf16.mxu0 %v2405_v0 }
  0x61   : > { %1858 = vmatmul.mubr.msk.bf16.gmra.mxu0 %vm458_vm0, %v434_v36 }
  0x62   : > { %619 = vmatprep.mubr.bf16.mxu0 %v2405_v0 }
  0x69   : > { %1859 = vmatmul.mubr.msk.bf16.gmra.mxu0 %vm458_vm0, %v435_v39 }
  0x6a   : > { %629 = vmatprep.mubr.bf16.mxu0 %v2405_v0 }
  0x71   : > { %1860 = vmatmul.mubr.msk.bf16.gmra.mxu0 %vm458_vm0, %v436_v42 }
  0x72   : > { %639 = vmatprep.mubr.bf16.mxu0 %v2405_v0 }
  0x79   : > { %1861 = vmatmul.mubr.msk.bf16.gmra.mxu0 %vm458_vm0, %v437_v45 }
  0x7a   : > { %649 = vmatprep.mubr.bf16.mxu0 %v2405_v0 }
  0x81   : > { %1862 = vmatmul.mubr.msk.bf16.gmra.mxu0 %vm458_vm0, %v438_v48 }
  0x82   : > { %659 = vmatprep.mubr.bf16.mxu0 %v2405_v0 }
  0x89   : > { %1863 = vmatmul.mubr.msk.bf16.gmra.mxu0 %vm458_vm0, %v439_v51 }
  0x8a   : > { %669 = vmatprep.mubr.bf16.mxu0 %v2405_v0 }
  0x91   : > { %1864 = vmatmul.mubr.msk.bf16.gmra.mxu0 %vm458_vm0, %v440_v54 }
  0x92   : > { %679 = vmatprep.mubr.bf16.mxu0 %v2405_v0 }
  0x99   : > { %1865 = vmatmul.mubr.msk.bf16.gmra.mxu0 %vm458_vm0, %v441_v57 }
  0x9a   : > { %689 = vmatprep.mubr.bf16.mxu0 %v2405_v0  ;;  %v454_v0 = vsub.s32 1, %v449_v63 }
  0x9c   : > { %v2599_v8 = vrot.slane %v394_v4, %v454_v0 }
  0xa1   : > { %1866 = vmatmul.mubr.msk.bf16.gmra.mxu0 %vm458_vm0, %v442_v60 }
  0xe9   : > { %v2586_v62 = vpop.f32.mrf.mxu0 }
  0xeb   : > { %v2588_v1 = vpop.f32.mrf.mxu0 }
  0xed   : > { %v2593_v2 = vpop.f32.mrf.mxu0 }
  0xef   : > { %v2595_v5 = vpop.f32.mrf.mxu0 }
  0xf1   : > { %v551_v6 = vpop.f32.mrf.mxu0 }
  0xf2   : > { %v2602_v10 = vadd.f32 %v551_v6, %v2597_v7 }
  0xf3   : > { %v553_v9 = vpop.f32.mrf.mxu0 }
  0xf4   : > { %v2605_v11 = vadd.f32 %v553_v9, %v2599_v8 }
  0xf5   : > { %v555_v12 = vpop.f32.mrf.mxu0 }
  0xf6   : > { %v706_v13 = vmax.f32 %v2602_v10, %v2605_v11  ;;  %v2610_v15 = vadd.f32 %v555_v12, %v2597_v7 }
  0xf7   : > { %v557_v14 = vpop.f32.mrf.mxu0 }
  0xf8   : > { %v2613_v16 = vadd.f32 %v557_v14, %v2599_v8  ;;  %707 = vmax.xlane.f32.xlu0 %v706_v13 }
  0xf9   : > { %v561_v17 = vpop.f32.mrf.mxu0 }
  0xfa   : > { %v709_v18 = vmax.f32 %v2610_v15, %v2613_v16  ;;  %v2618_v20 = vadd.f32 %v561_v17, %v2597_v7 }
  0xfb   : > { %v563_v19 = vpop.f32.mrf.mxu0 }
  0xfc   : > { %v2621_v21 = vadd.f32 %v563_v19, %v2599_v8  ;;  %710 = vmax.xlane.f32.xlu0 %v709_v18 }
  0xfd   : > { %v565_v22 = vpop.f32.mrf.mxu0 }
  0xfe   : > { %v712_v23 = vmax.f32 %v2618_v20, %v2621_v21  ;;  %v2626_v25 = vadd.f32 %v565_v22, %v2597_v7 }
  0xff   : > { %v567_v24 = vpop.f32.mrf.mxu0 }
 0x100   : > { %v2629_v26 = vadd.f32 %v567_v24, %v2599_v8  ;;  %713 = vmax.xlane.f32.xlu1 %v712_v23 }
 0x101   : > { %v571_v27 = vpop.f32.mrf.mxu0 }
 0x102   : > { %v715_v28 = vmax.f32 %v2626_v25, %v2629_v26  ;;  %v2634_v30 = vadd.f32 %v571_v27, %v2597_v7 }
 0x103   : > { %v573_v29 = vpop.f32.mrf.mxu0 }
 0x104   : > { %v2637_v31 = vadd.f32 %v573_v29, %v2599_v8  ;;  %716 = vmax.xlane.f32.xlu1 %v715_v28 }
 0x105   : > { %v575_v32 = vpop.f32.mrf.mxu0 }
 0x106   : > { %v718_v33 = vmax.f32 %v2634_v30, %v2637_v31  ;;  %v2642_v35 = vadd.f32 %v575_v32, %v2597_v7 }
 0x107   : > { %v577_v34 = vpop.f32.mrf.mxu0 }
 0x108   : > { %v2645_v36 = vadd.f32 %v577_v34, %v2599_v8  ;;  %719 = vmax.xlane.f32.xlu0 %v718_v33 }
 0x109   : > { %v581_v37 = vpop.f32.mrf.mxu0 }
 0x10a   : > { %v2648_v38 = vadd.f32 %v581_v37, %v2597_v7  ;;  %v721_v39 = vmax.f32 %v2642_v35, %v2645_v36 }
 0x10b   : > { %v583_v40 = vpop.f32.mrf.mxu0 }
 0x10c   : > { %v2653_v41 = vadd.f32 %v583_v40, %v2599_v8  ;;  %722 = vmax.xlane.f32.xlu1 %v721_v39 }
 0x10d   : > { %v585_v42 = vpop.f32.mrf.mxu0 }
 0x10e   : > { %v2656_v43 = vadd.f32 %v585_v42, %v2597_v7  ;;  %v724_v44 = vmax.f32 %v2648_v38, %v2653_v41 }
 0x10f   : > { %v587_v45 = vpop.f32.mrf.mxu0 }
 0x110   : > { %v2661_v46 = vadd.f32 %v587_v45, %v2599_v8  ;;  %725 = vmax.xlane.f32.xlu0 %v724_v44 }
 0x111   : > { %v591_v47 = vpop.f32.mrf.mxu0 }
 0x112   : > { %v2664_v48 = vadd.f32 %v591_v47, %v2597_v7  ;;  %v727_v49 = vmax.f32 %v2656_v43, %v2661_v46 }
 0x113   : > { %v593_v50 = vpop.f32.mrf.mxu0 }
 0x114   : > { %v2669_v51 = vadd.f32 %v593_v50, %v2599_v8  ;;  %728 = vmax.xlane.f32.xlu1 %v727_v49 }
 0x115   : > { %v595_v52 = vpop.f32.mrf.mxu0 }
 0x116   : > { %v2672_v53 = vadd.f32 %v595_v52, %v2597_v7  ;;  %v730_v54 = vmax.f32 %v2664_v48, %v2669_v51 }
 0x117   : > { %v597_v55 = vpop.f32.mrf.mxu0 }
 0x118   : > { %v2677_v56 = vadd.f32 %v597_v55, %v2599_v8  ;;  %731 = vmax.xlane.f32.xlu0 %v730_v54 }
 0x119   : > { %v601_v57 = vpop.f32.mrf.mxu0 }
 0x11a   : > { %v2680_v58 = vadd.f32 %v601_v57, %v2597_v7  ;;  %v733_v59 = vmax.f32 %v2672_v53, %v2677_v56 }
 0x11b   : > { %v603_v60 = vpop.f32.mrf.mxu0 }
 0x11c   : > { %v2685_v61 = vadd.f32 %v603_v60, %v2599_v8  ;;  %734 = vmax.xlane.f32.xlu1 %v733_v59 }
 0x11d   : > { %v605_v63 = vpop.f32.mrf.mxu0 }
 0x11e   : > { %v2688_v3 = vadd.f32 %v605_v63, %v2597_v7  ;;  %v736_v0 = vmax.f32 %v2680_v58, %v2685_v61 }
 0x11f   : > { %v607_v4 = vpop.f32.mrf.mxu0 }
 0x120   : > { %v2693_v6 = vadd.f32 %v607_v4, %v2599_v8  ;;  %737 = vmax.xlane.f32.xlu0 %v736_v0 }
 0x121   : > { %v611_v9 = vpop.f32.mrf.mxu0 }
 0x122   : > { %v2696_v12 = vadd.f32 %v611_v9, %v2597_v7  ;;  %v739_v13 = vmax.f32 %v2688_v3, %v2693_v6 }
 0x123   : > { %v613_v14 = vpop.f32.mrf.mxu0 }
 0x124   : > { %v2701_v17 = vadd.f32 %v613_v14, %v2599_v8  ;;  %740 = vmax.xlane.f32.xlu1 %v739_v13 }
 0x125   : > { %v615_v18 = vpop.f32.mrf.mxu0 }
 0x126   : > { %v2704_v19 = vadd.f32 %v615_v18, %v2597_v7  ;;  %v742_v22 = vmax.f32 %v2696_v12, %v2701_v17 }
 0x127   : > { %v617_v23 = vpop.f32.mrf.mxu0 }
 0x128   : > { %v2709_v24 = vadd.f32 %v617_v23, %v2599_v8  ;;  %743 = vmax.xlane.f32.xlu0 %v742_v22 }
 0x129   : > { %v621_v27 = vpop.f32.mrf.mxu0 }
 0x12a   : > { %v2712_v28 = vadd.f32 %v621_v27, %v2597_v7  ;;  %v745_v29 = vmax.f32 %v2704_v19, %v2709_v24 }
 0x12b   : > { %v623_v32 = vpop.f32.mrf.mxu0 }
 0x12c   : > { %v2717_v33 = vadd.f32 %v623_v32, %v2599_v8  ;;  %746 = vmax.xlane.f32.xlu1 %v745_v29 }
 0x12d   : > { %v625_v34 = vpop.f32.mrf.mxu0 }
 0x12e   : > { %v2720_v37 = vadd.f32 %v625_v34, %v2597_v7  ;;  %v748_v39 = vmax.f32 %v2712_v28, %v2717_v33 }
 0x12f   : > { %v627_v40 = vpop.f32.mrf.mxu0 }
 0x130   : > { %v2725_v42 = vadd.f32 %v627_v40, %v2599_v8  ;;  %749 = vmax.xlane.f32.xlu0 %v748_v39 }
 0x131   : > { %v631_v44 = vpop.f32.mrf.mxu0 }
 0x132   : > { %v2728_v45 = vadd.f32 %v631_v44, %v2597_v7  ;;  %v751_v47 = vmax.f32 %v2720_v37, %v2725_v42 }
 0x133   : > { %v633_v49 = vpop.f32.mrf.mxu0 }
 0x134   : > { %v2733_v50 = vadd.f32 %v633_v49, %v2599_v8  ;;  %752 = vmax.xlane.f32.xlu1 %v751_v47 }
 0x135   : > { %v635_v52 = vpop.f32.mrf.mxu0 }
 0x136   : > { %v2736_v54 = vadd.f32 %v635_v52, %v2597_v7  ;;  %v754_v55 = vmax.f32 %v2728_v45, %v2733_v50 }
 0x137   : > { %v637_v57 = vpop.f32.mrf.mxu0 }
 0x138   : > { %v2741_v59 = vadd.f32 %v637_v57, %v2599_v8  ;;  %755 = vmax.xlane.f32.xlu0 %v754_v55 }
 0x139   : > { %v641_v60 = vpop.f32.mrf.mxu0 }
 0x13a   : > { %v2744_v63 = vadd.f32 %v641_v60, %v2597_v7  ;;  %v757_v0 = vmax.f32 %v2736_v54, %v2741_v59 }
 0x13b   : > { %v643_v4 = vpop.f32.mrf.mxu0 }
 0x13c   : > { %v2749_v9 = vadd.f32 %v643_v4, %v2599_v8  ;;  %758 = vmax.xlane.f32.xlu1 %v757_v0 }
 0x13d   : > { %v645_v13 = vpop.f32.mrf.mxu0 }
 0x13e   : > { %v2752_v14 = vadd.f32 %v645_v13, %v2597_v7  ;;  %v760_v18 = vmax.f32 %v2744_v63, %v2749_v9 }
 0x13f   : > { %v647_v22 = vpop.f32.mrf.mxu0 }
 0x140   : > { %v2757_v23 = vadd.f32 %v647_v22, %v2599_v8  ;;  %761 = vmax.xlane.f32.xlu0 %v760_v18 }
 0x141   : > { %v651_v27 = vpop.f32.mrf.mxu0 }
 0x142   : > { %v2760_v29 = vadd.f32 %v651_v27, %v2597_v7  ;;  %v763_v32 = vmax.f32 %v2752_v14, %v2757_v23 }
 0x143   : > { %v653_v34 = vpop.f32.mrf.mxu0 }
 0x144   : > { %v2765_v39 = vadd.f32 %v653_v34, %v2599_v8  ;;  %764 = vmax.xlane.f32.xlu1 %v763_v32 }
 0x145   : > { %v655_v40 = vpop.f32.mrf.mxu0 }
 0x146   : > { %v2768_v44 = vadd.f32 %v655_v40, %v2597_v7  ;;  %v766_v47 = vmax.f32 %v2760_v29, %v2765_v39 }
 0x147   : > { %v657_v49 = vpop.f32.mrf.mxu0 }
 0x148   : > { %v2773_v52 = vadd.f32 %v657_v49, %v2599_v8  ;;  %767 = vmax.xlane.f32.xlu0 %v766_v47 }
 0x149   : > { %v661_v55 = vpop.f32.mrf.mxu0 }
 0x14a   : > { %v2776_v57 = vadd.f32 %v661_v55, %v2597_v7  ;;  %v769_v60 = vmax.f32 %v2768_v44, %v2773_v52 }
 0x14b   : > { %v663_v0 = vpop.f32.mrf.mxu0 }
 0x14c   : > { %3561 = vst [vmem:[#allocation9_spill] sm:$0xff] %v2776_v57  ;;  %v2781_v4 = vadd.f32 %v663_v0, %v2599_v8  ;;  %770 = vmax.xlane.f32.xlu1 %v769_v60 }
 0x14d   : > { %v665_v13 = vpop.f32.mrf.mxu0 }
 0x14e   : > { %3562 = vst [vmem:[#allocation10_spill] sm:$0xff] %v2781_v4  ;;  %v2784_v18 = vadd.f32 %v665_v13, %v2597_v7  ;;  %v772_v22 = vmax.f32 %v2776_v57, %v2781_v4 }
 0x14f   : > { %v667_v27 = vpop.f32.mrf.mxu0 }
 0x150   : > { %3563 = vst [vmem:[#allocation11_spill] sm:$0xff] %v2784_v18  ;;  %v2789_v32 = vadd.f32 %v667_v27, %v2599_v8  ;;  %773 = vmax.xlane.f32.xlu0 %v772_v22 }
 0x151   : > { %v671_v34 = vpop.f32.mrf.mxu0 }
 0x152   : > { %3564 = vst [vmem:[#allocation12_spill] sm:$0xff] %v2789_v32  ;;  %v2792_v40 = vadd.f32 %v671_v34, %v2597_v7  ;;  %v775_v47 = vmax.f32 %v2784_v18, %v2789_v32 }
 0x153   : > { %v673_v49 = vpop.f32.mrf.mxu0 }
 0x154   : > { %3565 = vst [vmem:[#allocation13_spill] sm:$0xff] %v2792_v40  ;;  %v2797_v55 = vadd.f32 %v673_v49, %v2599_v8  ;;  %776 = vmax.xlane.f32.xlu1 %v775_v47  ;;  %v425_v47 = vld [vmem:[%s2814_s14 + $0xf0] sm:$0xff]  ;;  %v426_v49 = vld [vmem:[%s2814_s14 + $0xf8] sm:$0xff] }
 0x155   : > { %v675_v60 = vpop.f32.mrf.mxu0 }
 0x156   : > { %3566 = vst [vmem:[#allocation14_spill] sm:$0xff] %v2797_v55  ;;  %v2800_v0 = vadd.f32 %v675_v60, %v2597_v7  ;;  %v778_v13 = vmax.f32 %v2792_v40, %v2797_v55  ;;  %v409_v60 = vld [vmem:[%s2814_s14 + $0x70] sm:$0xff]  ;;  %v410_v55 = vld [vmem:[%s2814_s14 + $0x78] sm:$0xff] }
 0x157   : > { %v677_v22 = vpop.f32.mrf.mxu0 }
 0x158   : > { %3567 = vst [vmem:[#allocation15_spill] sm:$0xff] %v2800_v0  ;;  %v2805_v27 = vadd.f32 %v677_v22, %v2599_v8  ;;  %779 = vmax.xlane.f32.xlu0 %v778_v13  ;;  %v1387_v22 = vpack.c.bf16 %v426_v49, %v425_v47  ;;  %v1379_v13 = vpack.c.bf16 %v410_v55, %v409_v60 }
 0x15a   : > { %3568 = vst [vmem:[#allocation16_spill] sm:$0xff] %v2805_v27  ;;  %v781_v34 = vmax.f32 %v2800_v0, %v2805_v27  ;;  %1992 = vmatprep.subr.bf16.mxu1 %v1387_v22  ;;  %1880 = vmatprep.subr.bf16.mxu0 %v1387_v22 }
 0x15b   : > { %2000 = vmatpush3.bf16.msra.mxu1 %v1379_v13  ;;  %1881 = vmatpush3.bf16.msra.mxu0 %v1379_v13 }
 0x15c   : > { %782 = vmax.xlane.f32.xlu1 %v781_v34 }
 0x181   : > { %v708_v34 = vpop.xlane.xlu0 %707 }
 0x182   : > { %v800_v27 = vsub.f32 %v2602_v10, %v708_v34  ;;  %v801_v0 = vsub.f32 %v2605_v11, %v708_v34  ;;  %v681_v10 = vpop.f32.mrf.mxu0 }
 0x184   : > { %v868_v40 = vmul.f32 1.442695, %v800_v27  ;;  %v870_v32 = vmul.f32 1.442695, %v801_v0 }
 0x185   : > { %v711_v18 = vpop.xlane.xlu0 %710 }
 0x186   : > { %2073 = vpow2.f32 %v868_v40  ;;  %v802_v4 = vsub.f32 %v2610_v15, %v711_v18  ;;  %v803_v57 = vsub.f32 %v2613_v16, %v711_v18  ;;  %v683_v16 = vpop.f32.mrf.mxu0 }
 0x187   : > { %2075 = vpow2.f32 %v870_v32 }
 0x188   : > { %v872_v47 = vmul.f32 1.442695, %v802_v4  ;;  %v874_v55 = vmul.f32 1.442695, %v803_v57  ;;  %v685_v32 = vpop.f32.mrf.mxu0 }
 0x189   : > { %v714_v49 = vpop.xlane.xlu1 %713 }
 0x18a   : > { %2077 = vpow2.f32 %v872_v47  ;;  %v804_v60 = vsub.f32 %v2618_v20, %v714_v49  ;;  %v805_v22 = vsub.f32 %v2621_v21, %v714_v49 }
 0x18b   : > { %2079 = vpow2.f32 %v874_v55  ;;  %v2838_v55 = vadd.f32 %v683_v16, %v2599_v8 }
 0x18c   : > { %v876_v11 = vmul.f32 1.442695, %v804_v60  ;;  %v878_v27 = vmul.f32 1.442695, %v805_v22 }
 0x18d   : > { %v717_v0 = vpop.xlane.xlu1 %716 }
 0x18e   : > { %2081 = vpow2.f32 %v876_v11  ;;  %v806_v40 = vsub.f32 %v2626_v25, %v717_v0  ;;  %v807_v15 = vsub.f32 %v2629_v26, %v717_v0  ;;  %v2835_v26 = vadd.f32 %v681_v10, %v2597_v7 }
 0x18f   : > { %2083 = vpow2.f32 %v878_v27 }
 0x190   : > { %v880_v4 = vmul.f32 1.442695, %v806_v40  ;;  %v882_v57 = vmul.f32 1.442695, %v807_v15  ;;  %v2849_v40 = vadd.f32 %v685_v32, %v2597_v7 }
 0x191   : > { %v720_v18 = vpop.xlane.xlu0 %719 }
 0x192   : > { %2085 = vpow2.f32 %v880_v4  ;;  %v808_v20 = vsub.f32 %v2634_v30, %v720_v18  ;;  %v809_v21 = vsub.f32 %v2637_v31, %v720_v18  ;;  %v687_v30 = vpop.f32.mrf.mxu0 }
 0x193   : > { %v2830_v13 = vpop.eup %2073  ;;  %2087 = vpow2.f32 %v882_v57  ;;  %v2852_v15 = vadd.f32 %v687_v30, %v2599_v8 }
 0x194   : > { %v2832_v34 = vpop.eup %2075  ;;  %v884_v47 = vmul.f32 1.442695, %v808_v20  ;;  %v886_v25 = vmul.f32 1.442695, %v809_v21  ;;  %v691_v18 = vpop.f32.mrf.mxu0 }
 0x195   : > { %v723_v49 = vpop.xlane.xlu1 %722  ;;  %v994_v60 = vadd.f32 %v2832_v34, %v2830_v13 }
 0x196   : > { %2089 = vpow2.f32 %v884_v47  ;;  %v810_v31 = vsub.f32 %v2642_v35, %v723_v49  ;;  %v811_v22 = vsub.f32 %v2645_v36, %v723_v49  ;;  %v784_v35 = vmax.f32 %v2835_v26, %v2838_v55 }
 0x197   : > { %v2844_v11 = vpop.eup %2077  ;;  %2091 = vpow2.f32 %v886_v25  ;;  %995 = vadd.xlane.f32.xlu0 %v994_v60  ;;  %v2866_v25 = vadd.f32 %v2588_v1, %v2599_v8  ;;  %v2878_v1 = vadd.f32 %v2586_v62, %v2597_v7 }
 0x198   : > { %v2846_v27 = vpop.eup %2079  ;;  %v888_v10 = vmul.f32 1.442695, %v810_v31  ;;  %v890_v0 = vmul.f32 1.442695, %v811_v22  ;;  %v693_v31 = vpop.f32.mrf.mxu0 }
 0x199   : > { %v726_v16 = vpop.xlane.xlu0 %725  ;;  %v997_v36 = vadd.f32 %v2846_v27, %v2844_v11 }
 0x19a   : > { %2093 = vpow2.f32 %v888_v10  ;;  %v812_v4 = vsub.f32 %v2648_v38, %v726_v16  ;;  %v813_v57 = vsub.f32 %v2653_v41, %v726_v16  ;;  %v787_v41 = vmax.f32 %v2849_v40, %v2852_v15  ;;  %v423_v10 = vld [vmem:[%s2814_s14 + $0xe0] sm:$0xff] }
 0x19b   : > { %v2860_v20 = vpop.eup %2081  ;;  %2095 = vpow2.f32 %v890_v0  ;;  %785 = vmax.xlane.f32.xlu0 %v784_v35  ;;  %998 = vadd.xlane.f32.xlu1 %v997_v36  ;;  %v424_v0 = vld [vmem:[%s2814_s14 + $0xe8] sm:$0xff] }
 0x19c   : > { %v2862_v32 = vpop.eup %2083  ;;  %v892_v21 = vmul.f32 1.442695, %v812_v4  ;;  %v894_v47 = vmul.f32 1.442695, %v813_v57  ;;  %v1386_v36 = vpack.c.bf16 %v424_v0, %v423_v10  ;;  %v407_v4 = vld [vmem:[%s2814_s14 + $0x60] sm:$0xff]  ;;  %v408_v57 = vld [vmem:[%s2814_s14 + $0x68] sm:$0xff] }
 0x19d   : > { %v729_v49 = vpop.xlane.xlu1 %728  ;;  %v1000_v38 = vadd.f32 %v2862_v32, %v2860_v20 }
 0x19e   : > { %2097 = vpow2.f32 %v892_v21  ;;  %v814_v60 = vsub.f32 %v2656_v43, %v729_v49  ;;  %v815_v30 = vsub.f32 %v2661_v46, %v729_v49  ;;  %v2886_v43 = vadd.f32 %v2595_v5, %v2599_v8  ;;  %v695_v5 = vpop.f32.mrf.mxu0  ;;  %1993 = vmatprep.subr.bf16.mxu1 %v1386_v36  ;;  %1882 = vmatprep.subr.bf16.mxu0 %v1386_v36 }
 0x19f   : > { %v2874_v22 = vpop.eup %2085  ;;  %2099 = vpow2.f32 %v894_v47  ;;  %1001 = vadd.xlane.f32.xlu0 %v1000_v38  ;;  %788 = vmax.xlane.f32.xlu1 %v787_v41  ;;  %v700_v47 = vmax.f32 %v2878_v1, %v2866_v25  ;;  %v1378_v49 = vpack.c.bf16 %v408_v57, %v407_v4  ;;  %v2896_v38 = vadd.f32 %v2593_v2, %v2597_v7  ;;  %v422_v4 = vld [vmem:[%s2814_s14 + $0xd8] sm:$0xff] }
 0x1a0   : > { %3569 = vst [vmem:[#allocation17_spill] sm:$0xff] %v2874_v22  ;;  %v2882_v16 = vpop.eup %2087  ;;  %v896_v35 = vmul.f32 1.442695, %v814_v60  ;;  %v898_v46 = vmul.f32 1.442695, %v815_v30 }
 0x1a1   : > { %v732_v21 = vpop.xlane.xlu0 %731  ;;  %v1003_v62 = vadd.f32 %v2882_v16, %v2874_v22  ;;  %2001 = vmatpush3.bf16.msra.mxu1 %v1378_v49  ;;  %1883 = vmatpush3.bf16.msra.mxu0 %v1378_v49 }
 0x1a2   : > { %2101 = vpow2.f32 %v896_v35  ;;  %v816_v41 = vsub.f32 %v2664_v48, %v732_v21  ;;  %v817_v60 = vsub.f32 %v2669_v51, %v732_v21  ;;  %v703_v35 = vmax.f32 %v2896_v38, %v2886_v43  ;;  %v421_v48 = vld [vmem:[%s2814_s14 + $0xd0] sm:$0xff] }
 0x1a3   : > { %v2900_v30 = vpop.eup %2089  ;;  %2103 = vpow2.f32 %v898_v46  ;;  %1004 = vadd.xlane.f32.xlu1 %v1003_v62  ;;  %701 = vmax.xlane.f32.xlu0 %v700_v47  ;;  %v2909_v51 = vadd.f32 %v691_v18, %v2597_v7  ;;  %v2912_v46 = vadd.f32 %v693_v31, %v2599_v8  ;;  %v1385_v21 = vpack.c.bf16 %v422_v4, %v421_v48  ;;  %v405_v62 = vld [vmem:[%s2814_s14 + $0x50] sm:$0xff]  ;;  %v406_v47 = vld [vmem:[%s2814_s14 + $0x58] sm:$0xff] }
 0x1a4   : > { %v2902_v10 = vpop.eup %2091  ;;  %v900_v2 = vmul.f32 1.442695, %v816_v41  ;;  %v902_v0 = vmul.f32 1.442695, %v817_v60  ;;  %v697_v41 = vpop.f32.mrf.mxu0  ;;  %v1377_v49 = vpack.c.bf16 %v406_v47, %v405_v62  ;;  %v2925_v48 = vadd.f32 %v695_v5, %v2597_v7  ;;  %v420_v7 = vld [vmem:[%s2814_s14 + $0xc8] sm:$0xff] }
 0x1a5   : > { %v735_v36 = vpop.xlane.xlu1 %734  ;;  %v1006_v57 = vadd.f32 %v2902_v10, %v2900_v30  ;;  %1994 = vmatprep.subr.bf16.mxu1 %v1385_v21  ;;  %1884 = vmatprep.subr.bf16.mxu0 %v1385_v21  ;;  %v403_v21 = vld [vmem:[%s2814_s14 + $0x40] sm:$0xff] }
 0x1a6   : > { %2105 = vpow2.f32 %v900_v2  ;;  %v818_v60 = vsub.f32 %v2672_v53, %v735_v36  ;;  %v819_v22 = vsub.f32 %v2677_v56, %v735_v36  ;;  %v2928_v53 = vadd.f32 %v697_v41, %v2599_v8  ;;  %2002 = vmatpush3.bf16.msra.mxu1 %v1377_v49  ;;  %v419_v36 = vld [vmem:[%s2814_s14 + $0xc0] sm:$0xff]  ;;  %1885 = vmatpush3.bf16.msra.mxu0 %v1377_v49  ;;  %v404_v8 = vld [vmem:[%s2814_s14 + $0x48] sm:$0xff] }
 0x1a7   : > { %v2920_v18 = vpop.eup %2093  ;;  %2107 = vpow2.f32 %v902_v0  ;;  %704 = vmax.xlane.f32.xlu1 %v703_v35  ;;  %1007 = vadd.xlane.f32.xlu0 %v1006_v57  ;;  %v790_v35 = vmax.f32 %v2909_v51, %v2912_v46  ;;  %v1384_v57 = vpack.c.bf16 %v420_v7, %v419_v36  ;;  %v1376_v47 = vpack.c.bf16 %v404_v8, %v403_v21  ;;  %v401_v7 = vld [vmem:[%s2814_s14 + $0x30] sm:$0xff] }
 0x1a8   : > { %v2922_v31 = vpop.eup %2095  ;;  %v904_v4 = vmul.f32 1.442695, %v818_v60  ;;  %v906_v2 = vmul.f32 1.442695, %v819_v22 }
 0x1a9   : > { %v738_v56 = vpop.xlane.xlu0 %737  ;;  %v1009_v0 = vadd.f32 %v2922_v31, %v2920_v18  ;;  %1995 = vmatprep.subr.bf16.mxu1 %v1384_v57  ;;  %1886 = vmatprep.subr.bf16.mxu0 %v1384_v57 }
 0x1aa   : > { %2109 = vpow2.f32 %v904_v4  ;;  %v820_v22 = vsub.f32 %v2680_v58, %v738_v56  ;;  %v821_v5 = vsub.f32 %v2685_v61, %v738_v56  ;;  %v793_v61 = vmax.f32 %v2925_v48, %v2928_v53  ;;  %2003 = vmatpush3.bf16.msra.mxu1 %v1376_v47  ;;  %v418_v56 = vld [vmem:[%s2814_s14 + $0xb8] sm:$0xff]  ;;  %1887 = vmatpush3.bf16.msra.mxu0 %v1376_v47 }
 0x1ab   : > { %v2940_v62 = vpop.eup %2097  ;;  %2111 = vpow2.f32 %v906_v2  ;;  %1010 = vadd.xlane.f32.xlu1 %v1009_v0  ;;  %791 = vmax.xlane.f32.xlu0 %v790_v35  ;;  %v417_v2 = vld [vmem:[%s2814_s14 + $0xb0] sm:$0xff] }
 0x1ac   : > { %v2942_v41 = vpop.eup %2099  ;;  %v908_v60 = vmul.f32 1.442695, %v820_v22  ;;  %v910_v49 = vmul.f32 1.442695, %v821_v5  ;;  %v1383_v36 = vpack.c.bf16 %v418_v56, %v417_v2  ;;  %v402_v22 = vld [vmem:[%s2814_s14 + $0x38] sm:$0xff]  ;;  %v399_v2 = vld [vmem:[%s2814_s14 + $0x20] sm:$0xff] }
 0x1ad   : > { %v741_v58 = vpop.xlane.xlu1 %740  ;;  %v1012_v4 = vadd.f32 %v2942_v41, %v2940_v62  ;;  %v1375_v57 = vpack.c.bf16 %v402_v22, %v401_v7  ;;  %v400_v56 = vld [vmem:[%s2814_s14 + $0x28] sm:$0xff] }
 0x1ae   : > { %2113 = vpow2.f32 %v908_v60  ;;  %v822_v0 = vsub.f32 %v2688_v3, %v741_v58  ;;  %v823_v35 = vsub.f32 %v2693_v6, %v741_v58  ;;  %1996 = vmatprep.subr.bf16.mxu1 %v1383_v36  ;;  %1888 = vmatprep.subr.bf16.mxu0 %v1383_v36  ;;  %v415_v60 = vld [vmem:[%s2814_s14 + $0xa0] sm:$0xff]  ;;  %v416_v58 = vld [vmem:[%s2814_s14 + $0xa8] sm:$0xff] }
 0x1af   : > { %v2954_v5 = vpop.eup %2101  ;;  %2115 = vpow2.f32 %v910_v49  ;;  %794 = vmax.xlane.f32.xlu1 %v793_v61  ;;  %1013 = vadd.xlane.f32.xlu0 %v1012_v4  ;;  %v1382_v4 = vpack.c.bf16 %v416_v58, %v415_v60  ;;  %v397_v60 = vld [vmem:[%s2814_s14 + $0x10] sm:$0xff]  ;;  %v398_v58 = vld [vmem:[%s2814_s14 + $0x18] sm:$0xff] }
 0x1b0   : > { %v2956_v21 = vpop.eup %2103  ;;  %v912_v8 = vmul.f32 1.442695, %v822_v0  ;;  %v914_v47 = vmul.f32 1.442695, %v823_v35  ;;  %2004 = vmatpush3.bf16.msra.mxu1 %v1375_v57  ;;  %1889 = vmatpush3.bf16.msra.mxu0 %v1375_v57  ;;  %v1374_v35 = vpack.c.bf16 %v400_v56, %v399_v2  ;;  %v413_v57 = vld [vmem:[%s2814_s14 + $0x90] sm:$0xff] }
 0x1b1   : > { %v744_v3 = vpop.xlane.xlu0 %743  ;;  %v1015_v6 = vadd.f32 %v2956_v21, %v2954_v5  ;;  %1997 = vmatprep.subr.bf16.mxu1 %v1382_v4  ;;  %1890 = vmatprep.subr.bf16.mxu0 %v1382_v4 }
 0x1b2   : > { %2117 = vpow2.f32 %v912_v8  ;;  %v824_v49 = vsub.f32 %v2696_v12, %v744_v3  ;;  %v825_v61 = vsub.f32 %v2701_v17, %v744_v3  ;;  %v414_v8 = vld [vmem:[%s2814_s14 + $0x98] sm:$0xff] }
 0x1b3   : > { %v2966_v0 = vpop.eup %2105  ;;  %2119 = vpow2.f32 %v914_v47  ;;  %1016 = vadd.xlane.f32.xlu1 %v1015_v6  ;;  %v1381_v6 = vpack.c.bf16 %v414_v8, %v413_v57  ;;  %v395_v57 = vld [vmem:[%s2814_s14] sm:$0xff]  ;;  %v396_v8 = vld [vmem:[%s2814_s14 + $0x8] sm:$0xff] }
 0x1b4   : > { %v2968_v36 = vpop.eup %2107  ;;  %v916_v7 = vmul.f32 1.442695, %v824_v49  ;;  %v918_v22 = vmul.f32 1.442695, %v825_v61  ;;  %2005 = vmatpush3.bf16.msra.mxu1 %v1374_v35  ;;  %1891 = vmatpush3.bf16.msra.mxu0 %v1374_v35  ;;  %v1373_v61 = vpack.c.bf16 %v398_v58, %v397_v60  ;;  %v411_v35 = vld [vmem:[%s2814_s14 + $0x80] sm:$0xff] }
 0x1b5   : > { %v747_v12 = vpop.xlane.xlu1 %746  ;;  %v1018_v17 = vadd.f32 %v2968_v36, %v2966_v0  ;;  %1998 = vmatprep.subr.bf16.mxu1 %v1381_v6  ;;  %1892 = vmatprep.subr.bf16.mxu0 %v1381_v6 }
 0x1b6   : > { %2121 = vpow2.f32 %v916_v7  ;;  %v826_v47 = vsub.f32 %v2704_v19, %v747_v12  ;;  %v827_v3 = vsub.f32 %v2709_v24, %v747_v12  ;;  %v412_v7 = vld [vmem:[%s2814_s14 + $0x88] sm:$0xff]  ;;  %s2406_s14 = smov [#allocation5]  }
 0x1b7   : > { %v2978_v49 = vpop.eup %2109  ;;  %2123 = vpow2.f32 %v918_v22  ;;  %1019 = vadd.xlane.f32.xlu0 %v1018_v17  ;;  %v1380_v17 = vpack.c.bf16 %v412_v7, %v411_v35  ;;  %s2301_s13 = sshll.u32 %s2406_s14, 4  ;;  %s2302_s13 = int_to_ptr.vmem [resolvable:$false] %s2301_s13 }
 0x1b8   : > { %v2980_v4 = vpop.eup %2111  ;;  %v920_v2 = vmul.f32 1.442695, %v826_v47  ;;  %v922_v56 = vmul.f32 1.442695, %v827_v3  ;;  %2006 = vmatpush3.bf16.msra.mxu1 %v1373_v61  ;;  %1893 = vmatpush3.bf16.msra.mxu0 %v1373_v61  ;;  %v1372_v3 = vpack.c.bf16 %v396_v8, %v395_v57  ;;  %p2304_p1 = scmp.lt.s32.totalorder %s3384_s21, %s2302_s13 }
 0x1b9   : > { %v750_v19 = vpop.xlane.xlu0 %749  ;;  %v1021_v24 = vadd.f32 %v2980_v4, %v2978_v49  ;;  %1999 = vmatprep.subr.bf16.mxu1 %v1380_v17  ;;  %1894 = vmatprep.subr.bf16.mxu0 %v1380_v17 }
 0x1ba   : > { %2125 = vpow2.f32 %v920_v2  ;;  %v828_v22 = vsub.f32 %v2712_v28, %v750_v19  ;;  %v829_v12 = vsub.f32 %v2717_v33, %v750_v19 }
 0x1bb   : > { %v2990_v47 = vpop.eup %2113  ;;  %2127 = vpow2.f32 %v922_v56  ;;  %1022 = vadd.xlane.f32.xlu1 %v1021_v24 }
 0x1bc   : > { %v2992_v6 = vpop.eup %2115  ;;  %v924_v60 = vmul.f32 1.442695, %v828_v22  ;;  %v926_v58 = vmul.f32 1.442695, %v829_v12  ;;  %2007 = vmatpush3.bf16.msra.mxu1 %v1372_v3  ;;  %1895 = vmatpush3.bf16.msra.mxu0 %v1372_v3 }
 0x1bd   : > { %v753_v61 = vpop.xlane.xlu1 %752  ;;  %v1024_v28 = vadd.f32 %v2992_v6, %v2990_v47 }
 0x1be   : > { %2129 = vpow2.f32 %v924_v60  ;;  %v830_v33 = vsub.f32 %v2720_v37, %v753_v61  ;;  %v831_v2 = vsub.f32 %v2725_v42, %v753_v61 }
 0x1bf   : > { %v2998_v56 = vpop.eup %2117  ;;  %2131 = vpow2.f32 %v926_v58  ;;  %1025 = vadd.xlane.f32.xlu0 %v1024_v28 }
 0x1c0   : > { %v3000_v19 = vpop.eup %2119  ;;  %v928_v24 = vmul.f32 1.442695, %v830_v33  ;;  %v930_v35 = vmul.f32 1.442695, %v831_v2 }
 0x1c1   : > { %v756_v7 = vpop.xlane.xlu0 %755  ;;  %v1027_v22 = vadd.f32 %v3000_v19, %v2998_v56 }
 0x1c2   : > { %2133 = vpow2.f32 %v928_v24  ;;  %v832_v12 = vsub.f32 %v2728_v45, %v756_v7  ;;  %v833_v17 = vsub.f32 %v2733_v50, %v756_v7 }
 0x1c3   : > { %v3006_v37 = vpop.eup %2121  ;;  %2135 = vpow2.f32 %v930_v35  ;;  %1028 = vadd.xlane.f32.xlu1 %v1027_v22 }
 0x1c4   : > { %v3008_v42 = vpop.eup %2123  ;;  %v932_v57 = vmul.f32 1.442695, %v832_v12  ;;  %v934_v8 = vmul.f32 1.442695, %v833_v17 }
 0x1c5   : > { %v759_v3 = vpop.xlane.xlu1 %758  ;;  %v1030_v60 = vadd.f32 %v3008_v42, %v3006_v37 }
 0x1c6   : > { %2137 = vpow2.f32 %v932_v57  ;;  %v834_v58 = vsub.f32 %v2736_v54, %v759_v3  ;;  %v835_v61 = vsub.f32 %v2741_v59, %v759_v3 }
 0x1c7   : > { %v3014_v45 = vpop.eup %2125  ;;  %2139 = vpow2.f32 %v934_v8  ;;  %1031 = vadd.xlane.f32.xlu0 %v1030_v60 }
 0x1c8   : > { %v3016_v50 = vpop.eup %2127  ;;  %v936_v28 = vmul.f32 1.442695, %v834_v58  ;;  %v938_v33 = vmul.f32 1.442695, %v835_v61 }
 0x1c9   : > { %v762_v2 = vpop.xlane.xlu0 %761  ;;  %v1033_v24 = vadd.f32 %v3016_v50, %v3014_v45 }
 0x1ca   : > { %2141 = vpow2.f32 %v936_v28  ;;  %v836_v35 = vsub.f32 %v2744_v63, %v762_v2  ;;  %v837_v7 = vsub.f32 %v2749_v9, %v762_v2 }
 0x1cb   : > { %v3022_v54 = vpop.eup %2129  ;;  %2143 = vpow2.f32 %v938_v33  ;;  %1034 = vadd.xlane.f32.xlu1 %v1033_v24 }
 0x1cc   : > { %v3024_v59 = vpop.eup %2131  ;;  %v940_v22 = vmul.f32 1.442695, %v836_v35  ;;  %v942_v12 = vmul.f32 1.442695, %v837_v7 }
 0x1cd   : > { %v765_v17 = vpop.xlane.xlu1 %764  ;;  %v1036_v57 = vadd.f32 %v3024_v59, %v3022_v54 }
 0x1ce   : > { %2145 = vpow2.f32 %v940_v22  ;;  %v838_v8 = vsub.f32 %v2752_v14, %v765_v17  ;;  %v839_v3 = vsub.f32 %v2757_v23, %v765_v17 }
 0x1cf   : > { %v3030_v63 = vpop.eup %2133  ;;  %2147 = vpow2.f32 %v942_v12  ;;  %1037 = vadd.xlane.f32.xlu0 %v1036_v57 }
 0x1d0   : > { %v3032_v9 = vpop.eup %2135  ;;  %v944_v60 = vmul.f32 1.442695, %v838_v8  ;;  %v946_v58 = vmul.f32 1.442695, %v839_v3 }
 0x1d1   : > { %v768_v61 = vpop.xlane.xlu0 %767  ;;  %v1039_v28 = vadd.f32 %v3032_v9, %v3030_v63 }
 0x1d2   : > { %2149 = vpow2.f32 %v944_v60  ;;  %v840_v33 = vsub.f32 %v2760_v29, %v768_v61  ;;  %v841_v2 = vsub.f32 %v2765_v39, %v768_v61 }
 0x1d3   : > { %v3038_v14 = vpop.eup %2137  ;;  %2151 = vpow2.f32 %v946_v58  ;;  %1040 = vadd.xlane.f32.xlu1 %v1039_v28  ;;  %v3570_v58 = vld [vmem:[#allocation9_spill] sm:$0xff]  ;;  %v3571_v28 = vld [vmem:[#allocation10_spill] sm:$0xff] }
 0x1d4   : > { %v3040_v23 = vpop.eup %2139  ;;  %v948_v24 = vmul.f32 1.442695, %v840_v33  ;;  %v950_v35 = vmul.f32 1.442695, %v841_v2 }
 0x1d5   : > { %v771_v7 = vpop.xlane.xlu1 %770  ;;  %v1042_v22 = vadd.f32 %v3040_v23, %v3038_v14 }
 0x1d6   : > { %2153 = vpow2.f32 %v948_v24  ;;  %v842_v12 = vsub.f32 %v2768_v44, %v771_v7  ;;  %v843_v17 = vsub.f32 %v2773_v52, %v771_v7 }
 0x1d7   : > { %v3046_v29 = vpop.eup %2141  ;;  %2155 = vpow2.f32 %v950_v35  ;;  %1043 = vadd.xlane.f32.xlu0 %v1042_v22  ;;  %v3574_v22 = vld [vmem:[#allocation11_spill] sm:$0xff] }
 0x1d8   : > { %v3048_v39 = vpop.eup %2143  ;;  %v952_v57 = vmul.f32 1.442695, %v842_v12  ;;  %v954_v8 = vmul.f32 1.442695, %v843_v17  ;;  %v3575_v17 = vld [vmem:[#allocation12_spill] sm:$0xff] }
 0x1d9   : > { %v774_v3 = vpop.xlane.xlu0 %773  ;;  %v1045_v60 = vadd.f32 %v3048_v39, %v3046_v29 }
 0x1da   : > { %2157 = vpow2.f32 %v952_v57  ;;  %v844_v61 = vsub.f32 %v3570_v58, %v774_v3  ;;  %v845_v33 = vsub.f32 %v3571_v28, %v774_v3 }
 0x1db   : > { %v3054_v44 = vpop.eup %2145  ;;  %2159 = vpow2.f32 %v954_v8  ;;  %1046 = vadd.xlane.f32.xlu1 %v1045_v60 }
 0x1dc   : > { %3572 = vst [vmem:[#allocation9_spill] sm:$0xff] %v3054_v44  ;;  %v3056_v52 = vpop.eup %2147  ;;  %v956_v2 = vmul.f32 1.442695, %v844_v61  ;;  %v958_v24 = vmul.f32 1.442695, %v845_v33  ;;  %v3578_v33 = vld [vmem:[#allocation13_spill] sm:$0xff] }
 0x1dd   : > { %3573 = vst [vmem:[#allocation10_spill] sm:$0xff] %v3056_v52  ;;  %v777_v35 = vpop.xlane.xlu1 %776  ;;  %v1048_v7 = vadd.f32 %v3056_v52, %v3054_v44 }
 0x1de   : > { %2161 = vpow2.f32 %v956_v2  ;;  %v846_v12 = vsub.f32 %v3574_v22, %v777_v35  ;;  %v847_v57 = vsub.f32 %v3575_v17, %v777_v35  ;;  %v3579_v2 = vld [vmem:[#allocation14_spill] sm:$0xff] }
 0x1df   : > { %v3062_v58 = vpop.eup %2149  ;;  %2163 = vpow2.f32 %v958_v24  ;;  %1049 = vadd.xlane.f32.xlu0 %v1048_v7 }
 0x1e0   : > { %3576 = vst [vmem:[#allocation11_spill] sm:$0xff] %v3062_v58  ;;  %v3064_v3 = vpop.eup %2151  ;;  %v960_v8 = vmul.f32 1.442695, %v846_v12  ;;  %v962_v60 = vmul.f32 1.442695, %v847_v57  ;;  %v3580_v57 = vld [vmem:[#allocation15_spill] sm:$0xff] }
 0x1e1   : > { %3577 = vst [vmem:[#allocation12_spill] sm:$0xff] %v3064_v3  ;;  %v780_v28 = vpop.xlane.xlu0 %779  ;;  %v1051_v61 = vadd.f32 %v3064_v3, %v3062_v58 }
 0x1e2   : > { %2165 = vpow2.f32 %v960_v8  ;;  %v848_v44 = vsub.f32 %v3578_v33, %v780_v28  ;;  %v849_v52 = vsub.f32 %v3579_v2, %v780_v28  ;;  %v3581_v8 = vld [vmem:[#allocation16_spill] sm:$0xff] }
 0x1e3   : > { %v3070_v22 = vpop.eup %2153  ;;  %2167 = vpow2.f32 %v962_v60  ;;  %1052 = vadd.xlane.f32.xlu1 %v1051_v61 }
 0x1e4   : > { %v3072_v35 = vpop.eup %2155  ;;  %v964_v24 = vmul.f32 1.442695, %v848_v44  ;;  %v966_v7 = vmul.f32 1.442695, %v849_v52 }
 0x1e5   : > { %v783_v17 = vpop.xlane.xlu1 %782  ;;  %v1054_v12 = vadd.f32 %v3072_v35, %v3070_v22 }
 0x1e6   : > { %2169 = vpow2.f32 %v964_v24  ;;  %v850_v58 = vsub.f32 %v3580_v57, %v783_v17  ;;  %v851_v3 = vsub.f32 %v3581_v8, %v783_v17 }
 0x1e7   : > { %v3078_v33 = vpop.eup %2157  ;;  %2171 = vpow2.f32 %v966_v7  ;;  %1055 = vadd.xlane.f32.xlu0 %v1054_v12 }
 0x1e8   : > { %3582 = vst [vmem:[#allocation13_spill] sm:$0xff] %v3078_v33  ;;  %v3080_v28 = vpop.eup %2159  ;;  %v968_v60 = vmul.f32 1.442695, %v850_v58  ;;  %v970_v61 = vmul.f32 1.442695, %v851_v3 }
 0x1e9   : > { %3583 = vst [vmem:[#allocation14_spill] sm:$0xff] %v3080_v28  ;;  %v1057_v44 = vadd.f32 %v3080_v28, %v3078_v33 }
 0x1ea   : > { %2173 = vpow2.f32 %v968_v60 }
 0x1eb   : > { %v3084_v52 = vpop.eup %2161  ;;  %2175 = vpow2.f32 %v970_v61  ;;  %1058 = vadd.xlane.f32.xlu1 %v1057_v44 }
 0x1ec   : > { %3584 = vst [vmem:[#allocation15_spill] sm:$0xff] %v3084_v52  ;;  %v3086_v2 = vpop.eup %2163 }
 0x1ed   : > { %3585 = vst [vmem:[#allocation16_spill] sm:$0xff] %v3086_v2  ;;  %v1060_v24 = vadd.f32 %v3086_v2, %v3084_v52 }
 0x1ef   : > { %v3090_v17 = vpop.eup %2165  ;;  %1061 = vadd.xlane.f32.xlu0 %v1060_v24 }
 0x1f0   : > { %3586 = vst [vmem:[#allocation18_spill] sm:$0xff] %v3090_v17  ;;  %v3092_v7 = vpop.eup %2167 }
 0x1f1   : > { %3587 = vst [vmem:[#allocation19_spill] sm:$0xff] %v3092_v7  ;;  %v1063_v58 = vadd.f32 %v3092_v7, %v3090_v17 }
 0x1f3   : > { %v3096_v3 = vpop.eup %2169  ;;  %1064 = vadd.xlane.f32.xlu1 %v1063_v58 }
 0x1f4   : > { %3588 = vst [vmem:[#allocation20_spill] sm:$0xff] %v3096_v3  ;;  %v3098_v12 = vpop.eup %2171 }
 0x1f5   : > { %3589 = vst [vmem:[#allocation21_spill] sm:$0xff] %v3098_v12  ;;  %v1066_v57 = vadd.f32 %v3098_v12, %v3096_v3 }
 0x1f7   : > { %v3102_v8 = vpop.eup %2173  ;;  %1067 = vadd.xlane.f32.xlu0 %v1066_v57 }
 0x1f8   : > { %3590 = vst [vmem:[#allocation22_spill] sm:$0xff] %v3102_v8  ;;  %v3104_v60 = vpop.eup %2175 }
 0x1f9   : > { %3591 = vst [vmem:[#allocation23_spill] sm:$0xff] %v3104_v60  ;;  %v1069_v61 = vadd.f32 %v3104_v60, %v3102_v8 }
 0x1fb   : > { %1070 = vadd.xlane.f32.xlu1 %v1069_v61 }
 0x220   : > { %v996_v44 = vpop.xlane.xlu0 %995 }
 0x221   : > { %2177 = vrcp.f32 %v996_v44 }
 0x224   : > { %v999_v24 = vpop.xlane.xlu1 %998  ;;  %v786_v17 = vpop.xlane.xlu0 %785 }
 0x225   : > { %2179 = vrcp.f32 %v999_v24  ;;  %v852_v58 = vsub.f32 %v2835_v26, %v786_v17  ;;  %v853_v7 = vsub.f32 %v2838_v55, %v786_v17 }
 0x227   : > { %v972_v52 = vmul.f32 1.442695, %v852_v58  ;;  %v974_v3 = vmul.f32 1.442695, %v853_v7 }
 0x228   : > { %v789_v12 = vpop.xlane.xlu1 %788  ;;  %v1002_v2 = vpop.xlane.xlu0 %1001 }
 0x229   : > { %2181 = vpow2.f32 %v972_v52  ;;  %v854_v57 = vsub.f32 %v2849_v40, %v789_v12  ;;  %v855_v33 = vsub.f32 %v2852_v15, %v789_v12 }
 0x22a   : > { %2183 = vpow2.f32 %v974_v3 }
 0x22b   : > { %v976_v61 = vmul.f32 1.442695, %v854_v57  ;;  %v978_v8 = vmul.f32 1.442695, %v855_v33  ;;  %2185 = vrcp.f32 %v1002_v2 }
 0x22c   : > { %v3112_v60 = vpop.xlane.xlu1 %1004  ;;  %v702_v28 = vpop.xlane.xlu0 %701 }
 0x22d   : > { %2187 = vpow2.f32 %v976_v61  ;;  %v796_v26 = vsub.f32 %v2878_v1, %v702_v28  ;;  %v797_v55 = vsub.f32 %v2866_v25, %v702_v28 }
 0x22e   : > { %v2178_v17 = vpop.eup %2177  ;;  %2189 = vpow2.f32 %v978_v8 }
 0x22f   : > { %v1118_v52 = vmul.f32 %v2178_v17, %v996_v44  ;;  %2191 = vrcp.f32 %v3112_v60  ;;  %v860_v40 = vmul.f32 1.442695, %v796_v26  ;;  %v862_v15 = vmul.f32 1.442695, %v797_v55 }
 0x230   : > { %v705_v33 = vpop.xlane.xlu1 %704  ;;  %v3120_v7 = vpop.xlane.xlu0 %1007 }
 0x231   : > { %v1150_v3 = vsub.f32 2.0, %v1118_v52  ;;  %2193 = vpow2.f32 %v860_v40  ;;  %v798_v12 = vsub.f32 %v2896_v38, %v705_v33  ;;  %v799_v1 = vsub.f32 %v2886_v43, %v705_v33 }
 0x232   : > { %v2180_v25 = vpop.eup %2179  ;;  %2195 = vpow2.f32 %v862_v15 }
 0x233   : > { %v1119_v28 = vmul.f32 %v2180_v25, %v999_v24  ;;  %v864_v8 = vmul.f32 1.442695, %v798_v12  ;;  %v866_v44 = vmul.f32 1.442695, %v799_v1  ;;  %2197 = vrcp.f32 %v3120_v7 }
 0x234   : > { %v3126_v58 = vpop.xlane.xlu1 %1010  ;;  %v792_v57 = vpop.xlane.xlu0 %791  ;;  %v1182_v61 = vmul.f32 %v2178_v17, %v1150_v3 }
 0x235   : > { %v1151_v26 = vsub.f32 2.0, %v1119_v28  ;;  %2199 = vpow2.f32 %v864_v8  ;;  %v856_v55 = vsub.f32 %v2909_v51, %v792_v57  ;;  %v857_v38 = vsub.f32 %v2912_v46, %v792_v57 }
 0x236   : > { %v3130_v52 = vpop.eup %2181  ;;  %2201 = vpow2.f32 %v866_v44  ;;  %v1217_v43 = vmul.f32 %v2832_v34, %v1182_v61  ;;  %v1216_v24 = vmul.f32 %v2830_v13, %v1182_v61 }
 0x237   : > { %v3134_v40 = vpop.eup %2183  ;;  %2203 = vrcp.f32 %v3126_v58  ;;  %v980_v15 = vmul.f32 1.442695, %v856_v55  ;;  %v982_v33 = vmul.f32 1.442695, %v857_v38  ;;  %v1183_v17 = vmul.f32 %v2180_v25, %v1151_v26 }
 0x238   : > { %v2186_v3 = vpop.eup %2185  ;;  %v795_v12 = vpop.xlane.xlu1 %794  ;;  %v1072_v51 = vadd.f32 %v3134_v40, %v3130_v52  ;;  %1281 = vst [vmem:[%s3141_s15 + $0x28] sm:$0xff] %v1217_v43  ;;  %1280 = vst [vmem:[%s3141_s15 + $0x20] sm:$0xff] %v1216_v24 }
 0x239   : > { %v3137_v1 = vpop.xlane.xlu0 %1013  ;;  %v1120_v13 = vmul.f32 %v2186_v3, %v1002_v2  ;;  %2205 = vpow2.f32 %v980_v15  ;;  %v858_v34 = vsub.f32 %v2925_v48, %v795_v12  ;;  %v859_v46 = vsub.f32 %v2928_v53, %v795_v12 }
 0x23a   : > { %v3147_v25 = vpop.eup %2187  ;;  %2207 = vpow2.f32 %v982_v33  ;;  %1073 = vadd.xlane.f32.xlu0 %v1072_v51  ;;  %v1219_v28 = vmul.f32 %v2846_v27, %v1183_v17  ;;  %v1218_v8 = vmul.f32 %v2844_v11, %v1183_v17 }
 0x23b   : > { %v3151_v44 = vpop.eup %2189  ;;  %v1152_v57 = vsub.f32 2.0, %v1120_v13  ;;  %v984_v61 = vmul.f32 1.442695, %v858_v34  ;;  %v986_v2 = vmul.f32 1.442695, %v859_v46  ;;  %2209 = vrcp.f32 %v3137_v1 }
 0x23c   : > { %v2192_v26 = vpop.eup %2191  ;;  %v3154_v48 = vpop.xlane.xlu1 %1016  ;;  %1283 = vst [vmem:[%s3141_s15 + $0x38] sm:$0xff] %v1219_v28  ;;  %v1343_v53 = vpack.c.bf16 %v1219_v28, %v1217_v43  ;;  %v1075_v55 = vadd.f32 %v3151_v44, %v3147_v25  ;;  %1282 = vst [vmem:[%s3141_s15 + $0x30] sm:$0xff] %v1218_v8  ;;  %v1342_v38 = vpack.c.bf16 %v1218_v8, %v1216_v24  ;;  %v3592_v28 = vld [vmem:[#allocation17_spill] sm:$0xff] }
 0x23d   : > { %v1184_v27 = vmul.f32 %v2186_v3, %v1152_v57  ;;  %v1121_v11 = vmul.f32 %v2192_v26, %v3112_v60  ;;  %2211 = vpow2.f32 %v984_v61 }
 0x23e   : > { %v3161_v15 = vpop.eup %2193  ;;  %2213 = vpow2.f32 %v986_v2  ;;  %1428 = vmatprep.mubr.bf16.mxu1 %v1343_v53  ;;  %1076 = vadd.xlane.f32.xlu1 %v1075_v55 }
 0x23f   : > { %v3163_v33 = vpop.eup %2195  ;;  %v1153_v17 = vsub.f32 2.0, %v1121_v11  ;;  %2215 = vrcp.f32 %v3154_v48  ;;  %1429 = vmatmul.mubr.bf16.vlgmr.msra.gmra.mxu1 %v1342_v38  ;;  %v1221_v43 = vmul.f32 %v2862_v32, %v1184_v27  ;;  %v1220_v24 = vmul.f32 %v2860_v20, %v1184_v27 }
 0x240   : > { %v2198_v3 = vpop.eup %2197  ;;  %v1020_v60 = vpop.xlane.xlu0 %1019  ;;  %v988_v12 = vadd.f32 %v3163_v33, %v3161_v15 }
 0x241   : > { %v1185_v51 = vmul.f32 %v2192_v26, %v1153_v17  ;;  %v1122_v13 = vmul.f32 %v2198_v3, %v3120_v7  ;;  %2217 = vrcp.f32 %v1020_v60  ;;  %1285 = vst [vmem:[%s3141_s15 + $0x48] sm:$0xff] %v1221_v43  ;;  %1284 = vst [vmem:[%s3141_s15 + $0x40] sm:$0xff] %v1220_v24 }
 0x242   : > { %v3173_v34 = vpop.eup %2199  ;;  %989 = vadd.xlane.f32.xlu0 %v988_v12 }
 0x243   : > { %v3175_v46 = vpop.eup %2201  ;;  %v1154_v32 = vsub.f32 2.0, %v1122_v13  ;;  %v1223_v20 = vmul.f32 %v2882_v16, %v1185_v51  ;;  %v1222_v8 = vmul.f32 %v3592_v28, %v1185_v51 }
 0x244   : > { %v2204_v57 = vpop.eup %2203  ;;  %v1023_v61 = vpop.xlane.xlu1 %1022  ;;  %v991_v7 = vadd.f32 %v3175_v46, %v3173_v34 }
 0x245   : > { %v1186_v2 = vmul.f32 %v2198_v3, %v1154_v32  ;;  %v1123_v26 = vmul.f32 %v2204_v57, %v3126_v58  ;;  %2219 = vrcp.f32 %v1023_v61  ;;  %1287 = vst [vmem:[%s3141_s15 + $0x58] sm:$0xff] %v1223_v20  ;;  %v1345_v53 = vpack.c.bf16 %v1223_v20, %v1221_v43  ;;  %1286 = vst [vmem:[%s3141_s15 + $0x50] sm:$0xff] %v1222_v8 }
 0x246   : > { %v3184_v55 = vpop.eup %2205  ;;  %992 = vadd.xlane.f32.xlu1 %v991_v7  ;;  %v1344_v16 = vpack.c.bf16 %v1222_v8, %v1220_v24 }
 0x247   : > { %v3186_v38 = vpop.eup %2207  ;;  %v1155_v27 = vsub.f32 2.0, %v1123_v26  ;;  %1436 = vmatprep.mubr.bf16.mxu1 %v1345_v53  ;;  %v1225_v11 = vmul.f32 %v2902_v10, %v1186_v2  ;;  %v1224_v17 = vmul.f32 %v2900_v30, %v1186_v2 }
 0x248   : > { %v2210_v3 = vpop.eup %2209  ;;  %1437 = vmatmul.mubr.bf16.gmra.mxu1 %v1344_v16  ;;  %v1026_v58 = vpop.xlane.xlu0 %1025  ;;  %v1078_v43 = vadd.f32 %v3186_v38, %v3184_v55 }
 0x249   : > { %v1187_v12 = vmul.f32 %v2204_v57, %v1155_v27  ;;  %v1124_v51 = vmul.f32 %v2210_v3, %v3137_v1  ;;  %2221 = vrcp.f32 %v1026_v58  ;;  %1289 = vst [vmem:[%s3141_s15 + $0x68] sm:$0xff] %v1225_v11  ;;  %1288 = vst [vmem:[%s3141_s15 + $0x60] sm:$0xff] %v1224_v17 }
 0x24a   : > { %v3195_v24 = vpop.eup %2211  ;;  %1079 = vadd.xlane.f32.xlu0 %v1078_v43 }
 0x24b   : > { %v3197_v10 = vpop.eup %2213  ;;  %v1156_v30 = vsub.f32 2.0, %v1124_v51  ;;  %v1227_v13 = vmul.f32 %v2922_v31, %v1187_v12  ;;  %v1226_v32 = vmul.f32 %v2920_v18, %v1187_v12 }
 0x24c   : > { %v2216_v20 = vpop.eup %2215  ;;  %v1029_v28 = vpop.xlane.xlu1 %1028  ;;  %v1081_v1 = vadd.f32 %v3197_v10, %v3195_v24 }
 0x24d   : > { %v1188_v8 = vmul.f32 %v2210_v3, %v1156_v30  ;;  %v1125_v57 = vmul.f32 %v2216_v20, %v3154_v48  ;;  %2223 = vrcp.f32 %v1029_v28  ;;  %1291 = vst [vmem:[%s3141_s15 + $0x78] sm:$0xff] %v1227_v13  ;;  %v1347_v7 = vpack.c.bf16 %v1227_v13, %v1225_v11  ;;  %1290 = vst [vmem:[%s3141_s15 + $0x70] sm:$0xff] %v1226_v32 }
 0x24e   : > { %v2218_v2 = vpop.eup %2217  ;;  %1082 = vadd.xlane.f32.xlu1 %v1081_v1  ;;  %v1346_v26 = vpack.c.bf16 %v1226_v32, %v1224_v17 }
 0x24f   : > { %v1157_v31 = vsub.f32 2.0, %v1125_v57  ;;  %v1126_v53 = vmul.f32 %v2218_v2, %v1020_v60  ;;  %1444 = vmatprep.mubr.bf16.mxu1 %v1347_v7  ;;  %v1229_v18 = vmul.f32 %v2942_v41, %v1188_v8  ;;  %v1228_v16 = vmul.f32 %v2940_v62, %v1188_v8 }
 0x250   : > { %1445 = vmatmul.mubr.bf16.gmra.mxu1 %v1346_v26  ;;  %v1032_v27 = vpop.xlane.xlu0 %1031 }
 0x251   : > { %v1189_v48 = vmul.f32 %v2216_v20, %v1157_v31  ;;  %v1158_v3 = vsub.f32 2.0, %v1126_v53  ;;  %2225 = vrcp.f32 %v1032_v27  ;;  %1293 = vst [vmem:[%s3141_s15 + $0x88] sm:$0xff] %v1229_v18  ;;  %1292 = vst [vmem:[%s3141_s15 + $0x80] sm:$0xff] %v1228_v16 }
 0x252   : > { %v2220_v11 = vpop.eup %2219 }
 0x253   : > { %v1190_v43 = vmul.f32 %v2218_v2, %v1158_v3  ;;  %v1127_v12 = vmul.f32 %v2220_v11, %v1023_v61  ;;  %v1231_v17 = vmul.f32 %v2956_v21, %v1189_v48  ;;  %v1230_v60 = vmul.f32 %v2954_v5, %v1189_v48 }
 0x254   : > { %v1035_v41 = vpop.xlane.xlu1 %1034 }
 0x255   : > { %v1159_v62 = vsub.f32 2.0, %v1127_v12  ;;  %2227 = vrcp.f32 %v1035_v41  ;;  %1295 = vst [vmem:[%s3141_s15 + $0x98] sm:$0xff] %v1231_v17  ;;  %v1349_v51 = vpack.c.bf16 %v1231_v17, %v1229_v18  ;;  %1294 = vst [vmem:[%s3141_s15 + $0x90] sm:$0xff] %v1230_v60  ;;  %v1348_v30 = vpack.c.bf16 %v1230_v60, %v1228_v16 }
 0x256   : > { %v2222_v13 = vpop.eup %2221  ;;  %v1233_v32 = vmul.f32 %v2968_v36, %v1190_v43  ;;  %v1232_v20 = vmul.f32 %v2966_v0, %v1190_v43 }
 0x257   : > { %v1191_v61 = vmul.f32 %v2220_v11, %v1159_v62  ;;  %v1128_v21 = vmul.f32 %v2222_v13, %v1026_v58  ;;  %1452 = vmatprep.mubr.bf16.mxu1 %v1349_v51 }
 0x258   : > { %1453 = vmatmul.mubr.bf16.gmra.mxu1 %v1348_v30  ;;  %v1038_v5 = vpop.xlane.xlu0 %1037  ;;  %1297 = vst [vmem:[%s3141_s15 + $0xa8] sm:$0xff] %v1233_v32  ;;  %1296 = vst [vmem:[%s3141_s15 + $0xa0] sm:$0xff] %v1232_v20 }
 0x259   : > { %v1160_v1 = vsub.f32 2.0, %v1128_v21  ;;  %2229 = vrcp.f32 %v1038_v5  ;;  %v1235_v8 = vmul.f32 %v2980_v4, %v1191_v61  ;;  %v1234_v57 = vmul.f32 %v2978_v49, %v1191_v61 }
 0x25a   : > { %v2224_v7 = vpop.eup %2223 }
 0x25b   : > { %v1192_v36 = vmul.f32 %v2222_v13, %v1160_v1  ;;  %v1129_v2 = vmul.f32 %v2224_v7, %v1029_v28  ;;  %1299 = vst [vmem:[%s3141_s15 + $0xb8] sm:$0xff] %v1235_v8  ;;  %v1351_v0 = vpack.c.bf16 %v1235_v8, %v1233_v32  ;;  %1298 = vst [vmem:[%s3141_s15 + $0xb0] sm:$0xff] %v1234_v57 }
 0x25c   : > { %v1041_v58 = vpop.xlane.xlu1 %1040  ;;  %v1350_v26 = vpack.c.bf16 %v1234_v57, %v1232_v20 }
 0x25d   : > { %v1161_v31 = vsub.f32 2.0, %v1129_v2  ;;  %2231 = vrcp.f32 %v1041_v58  ;;  %1460 = vmatprep.mubr.bf16.mxu1 %v1351_v0  ;;  %v1237_v53 = vmul.f32 %v2992_v6, %v1192_v36  ;;  %v1236_v4 = vmul.f32 %v2990_v47, %v1192_v36 }
 0x25e   : > { %v2226_v18 = vpop.eup %2225 }
 0x25f   : > { %v1193_v49 = vmul.f32 %v2224_v7, %v1161_v31  ;;  %v1130_v16 = vmul.f32 %v2226_v18, %v1032_v27  ;;  %1301 = vst [vmem:[%s3141_s15 + $0xc8] sm:$0xff] %v1237_v53  ;;  %1300 = vst [vmem:[%s3141_s15 + $0xc0] sm:$0xff] %v1236_v4 }
 0x260   : > { %1461 = vmatmul.mubr.bf16.gmra.mxu1 %v1350_v26  ;;  %v1044_v28 = vpop.xlane.xlu0 %1043 }
 0x261   : > { %v1162_v48 = vsub.f32 2.0, %v1130_v16  ;;  %2233 = vrcp.f32 %v1044_v28  ;;  %v1239_v3 = vmul.f32 %v3000_v19, %v1193_v49  ;;  %v1238_v11 = vmul.f32 %v2998_v56, %v1193_v49 }
 0x262   : > { %v2228_v43 = vpop.eup %2227 }
 0x263   : > { %v1194_v6 = vmul.f32 %v2226_v18, %v1162_v48  ;;  %v1131_v12 = vmul.f32 %v2228_v43, %v1035_v41  ;;  %1303 = vst [vmem:[%s3141_s15 + $0xd8] sm:$0xff] %v1239_v3  ;;  %v1353_v47 = vpack.c.bf16 %v1239_v3, %v1237_v53  ;;  %1302 = vst [vmem:[%s3141_s15 + $0xd0] sm:$0xff] %v1238_v11 }
 0x264   : > { %v1047_v17 = vpop.xlane.xlu1 %1046  ;;  %v1352_v27 = vpack.c.bf16 %v1238_v11, %v1236_v4 }
 0x265   : > { %v1163_v60 = vsub.f32 2.0, %v1131_v12  ;;  %2235 = vrcp.f32 %v1047_v17  ;;  %1468 = vmatprep.mubr.bf16.mxu1 %v1353_v47  ;;  %v1241_v62 = vmul.f32 %v3008_v42, %v1194_v6  ;;  %v1240_v19 = vmul.f32 %v3006_v37, %v1194_v6 }
 0x266   : > { %v2230_v51 = vpop.eup %2229 }
 0x267   : > { %v1195_v56 = vmul.f32 %v2228_v43, %v1163_v60  ;;  %v1132_v30 = vmul.f32 %v2230_v51, %v1038_v5  ;;  %1305 = vst [vmem:[%s3141_s15 + $0xe8] sm:$0xff] %v1241_v62  ;;  %1304 = vst [vmem:[%s3141_s15 + $0xe0] sm:$0xff] %v1240_v19 }
 0x268   : > { %1469 = vmatmul.mubr.bf16.gmra.mxu1 %v1352_v27  ;;  %v1050_v41 = vpop.xlane.xlu0 %1049 }
 0x269   : > { %v1164_v13 = vsub.f32 2.0, %v1132_v30  ;;  %2237 = vrcp.f32 %v1050_v41  ;;  %v1243_v32 = vmul.f32 %v3016_v50, %v1195_v56  ;;  %v1242_v20 = vmul.f32 %v3014_v45, %v1195_v56 }
 0x26a   : > { %v2232_v61 = vpop.eup %2231 }
 0x26b   : > { %v1196_v42 = vmul.f32 %v2230_v51, %v1164_v13  ;;  %v1133_v21 = vmul.f32 %v2232_v61, %v1041_v58  ;;  %1307 = vst [vmem:[%s3141_s15 + $0xf8] sm:$0xff] %v1243_v32  ;;  %v1355_v37 = vpack.c.bf16 %v1243_v32, %v1241_v62  ;;  %1306 = vst [vmem:[%s3141_s15 + $0xf0] sm:$0xff] %v1242_v20  ;;  %v3593_v62 = vld [vmem:[#allocation10_spill] sm:$0xff]  ;;  %v3594_v51 = vld [vmem:[#allocation9_spill] sm:$0xff] }
 0x26c   : > { %v1053_v1 = vpop.xlane.xlu1 %1052  ;;  %v1354_v5 = vpack.c.bf16 %v1242_v20, %v1240_v19  ;;  %v3595_v32 = vld [vmem:[#allocation12_spill] sm:$0xff] }
 0x26d   : > { %v1165_v8 = vsub.f32 2.0, %v1133_v21  ;;  %2239 = vrcp.f32 %v1053_v1  ;;  %1476 = vmatprep.mubr.bf16.mxu1 %v1355_v37  ;;  %v1245_v57 = vmul.f32 %v3024_v59, %v1196_v42  ;;  %v1244_v50 = vmul.f32 %v3022_v54, %v1196_v42 }
 0x26e   : > { %v2234_v7 = vpop.eup %2233 }
 0x26f   : > { %v1197_v45 = vmul.f32 %v2232_v61, %v1165_v8  ;;  %v1134_v36 = vmul.f32 %v2234_v7, %v1044_v28  ;;  %1309 = vst [vmem:[%s3141_s15 + $0x108] sm:$0xff] %v1245_v57  ;;  %1308 = vst [vmem:[%s3141_s15 + $0x100] sm:$0xff] %v1244_v50  ;;  %v3596_v61 = vld [vmem:[#allocation11_spill] sm:$0xff] }
 0x270   : > { %1477 = vmatmul.mubr.bf16.gmra.mxu1 %v1354_v5  ;;  %v1056_v2 = vpop.xlane.xlu0 %1055 }
 0x271   : > { %v1166_v0 = vsub.f32 2.0, %v1134_v36  ;;  %2241 = vrcp.f32 %v1056_v2  ;;  %v1247_v58 = vmul.f32 %v3032_v9, %v1197_v45  ;;  %v1246_v26 = vmul.f32 %v3030_v63, %v1197_v45 }
 0x272   : > { %v2236_v31 = vpop.eup %2235 }
 0x273   : > { %v1198_v59 = vmul.f32 %v2234_v7, %v1166_v0  ;;  %v1135_v53 = vmul.f32 %v2236_v31, %v1047_v17  ;;  %1311 = vst [vmem:[%s3141_s15 + $0x118] sm:$0xff] %v1247_v58  ;;  %v1357_v54 = vpack.c.bf16 %v1247_v58, %v1245_v57  ;;  %1310 = vst [vmem:[%s3141_s15 + $0x110] sm:$0xff] %v1246_v26 }
 0x274   : > { %v1059_v4 = vpop.xlane.xlu1 %1058  ;;  %v1356_v18 = vpack.c.bf16 %v1246_v26, %v1244_v50  ;;  %v3597_v26 = vld [vmem:[#allocation14_spill] sm:$0xff] }
 0x275   : > { %v1167_v49 = vsub.f32 2.0, %v1135_v53  ;;  %2243 = vrcp.f32 %v1059_v4  ;;  %1484 = vmatprep.mubr.bf16.mxu1 %v1357_v54  ;;  %v1249_v16 = vmul.f32 %v3040_v23, %v1198_v59  ;;  %v1248_v9 = vmul.f32 %v3038_v14, %v1198_v59  ;;  %v3598_v59 = vld [vmem:[#allocation13_spill] sm:$0xff] }
 0x276   : > { %v2238_v28 = vpop.eup %2237 }
 0x277   : > { %v1199_v63 = vmul.f32 %v2236_v31, %v1167_v49  ;;  %v1136_v48 = vmul.f32 %v2238_v28, %v1050_v41  ;;  %1313 = vst [vmem:[%s3141_s15 + $0x128] sm:$0xff] %v1249_v16  ;;  %1312 = vst [vmem:[%s3141_s15 + $0x120] sm:$0xff] %v1248_v9 }
 0x278   : > { %1485 = vmatmul.mubr.bf16.gmra.mxu1 %v1356_v18  ;;  %v1062_v3 = vpop.xlane.xlu0 %1061 }
 0x279   : > { %v1168_v11 = vsub.f32 2.0, %v1136_v48  ;;  %2245 = vrcp.f32 %v1062_v3  ;;  %v1251_v43 = vmul.f32 %v3048_v39, %v1199_v63  ;;  %v1250_v6 = vmul.f32 %v3046_v29, %v1199_v63 }
 0x27a   : > { %v2240_v12 = vpop.eup %2239 }
 0x27b   : > { %v1200_v23 = vmul.f32 %v2238_v28, %v1168_v11  ;;  %v1137_v47 = vmul.f32 %v2240_v12, %v1053_v1  ;;  %1315 = vst [vmem:[%s3141_s15 + $0x138] sm:$0xff] %v1251_v43  ;;  %v1359_v14 = vpack.c.bf16 %v1251_v43, %v1249_v16  ;;  %1314 = vst [vmem:[%s3141_s15 + $0x130] sm:$0xff] %v1250_v6  ;;  %v3599_v16 = vld [vmem:[#allocation16_spill] sm:$0xff]  ;;  %v3600_v28 = vld [vmem:[#allocation15_spill] sm:$0xff] }
 0x27c   : > { %v1065_v17 = vpop.xlane.xlu1 %1064  ;;  %v1358_v27 = vpack.c.bf16 %v1250_v6, %v1248_v9  ;;  %v3601_v6 = vld [vmem:[#allocation19_spill] sm:$0xff] }
 0x27d   : > { %v1169_v60 = vsub.f32 2.0, %v1137_v47  ;;  %2247 = vrcp.f32 %v1065_v17  ;;  %1492 = vmatprep.mubr.bf16.mxu1 %v1359_v14  ;;  %v1253_v19 = vmul.f32 %v3593_v62, %v1200_v23  ;;  %v1252_v39 = vmul.f32 %v3594_v51, %v1200_v23  ;;  %v3602_v23 = vld [vmem:[#allocation18_spill] sm:$0xff]  ;;  %v3603_v51 = vld [vmem:[#allocation21_spill] sm:$0xff] }
 0x27e   : > { %v2242_v56 = vpop.eup %2241 }
 0x27f   : > { %v1201_v29 = vmul.f32 %v2240_v12, %v1169_v60  ;;  %v1138_v30 = vmul.f32 %v2242_v56, %v1056_v2  ;;  %1317 = vst [vmem:[%s3141_s15 + $0x148] sm:$0xff] %v1253_v19  ;;  %1316 = vst [vmem:[%s3141_s15 + $0x140] sm:$0xff] %v1252_v39 }
 0x280   : > { %1493 = vmatmul.mubr.bf16.gmra.mxu1 %v1358_v27  ;;  %v1068_v41 = vpop.xlane.xlu0 %1067 }
 0x281   : > { %v1170_v13 = vsub.f32 2.0, %v1138_v30  ;;  %2249 = vrcp.f32 %v1068_v41  ;;  %v1255_v20 = vmul.f32 %v3595_v32, %v1201_v29  ;;  %v1254_v42 = vmul.f32 %v3596_v61, %v1201_v29  ;;  %v3606_v32 = vld [vmem:[#allocation22_spill] sm:$0xff] }
 0x282   : > { %v2244_v21 = vpop.eup %2243 }
 0x283   : > { %v1202_v37 = vmul.f32 %v2242_v56, %v1170_v13  ;;  %v1139_v1 = vmul.f32 %v2244_v21, %v1059_v4  ;;  %1319 = vst [vmem:[%s3141_s15 + $0x158] sm:$0xff] %v1255_v20  ;;  %v1361_v5 = vpack.c.bf16 %v1255_v20, %v1253_v19  ;;  %1318 = vst [vmem:[%s3141_s15 + $0x150] sm:$0xff] %v1254_v42  ;;  %v3604_v56 = vld [vmem:[#allocation20_spill] sm:$0xff] }
 0x284   : > { %v1071_v8 = vpop.xlane.xlu1 %1070  ;;  %v1360_v57 = vpack.c.bf16 %v1254_v42, %v1252_v39 }
 0x285   : > { %v1171_v50 = vsub.f32 2.0, %v1139_v1  ;;  %2251 = vrcp.f32 %v1071_v8  ;;  %1500 = vmatprep.mubr.bf16.mxu1 %v1361_v5  ;;  %v1257_v7 = vmul.f32 %v3072_v35, %v1202_v37  ;;  %v1256_v45 = vmul.f32 %v3070_v22, %v1202_v37 }
 0x286   : > { %v2246_v36 = vpop.eup %2245 }
 0x287   : > { %v1203_v2 = vmul.f32 %v2244_v21, %v1171_v50  ;;  %v1140_v0 = vmul.f32 %v2246_v36, %v1062_v3  ;;  %1321 = vst [vmem:[%s3141_s15 + $0x168] sm:$0xff] %v1257_v7  ;;  %1320 = vst [vmem:[%s3141_s15 + $0x160] sm:$0xff] %v1256_v45 }
 0x288   : > { %1501 = vmatmul.mubr.bf16.gmra.mxu1 %v1360_v57 }
 0x289   : > { %v1172_v58 = vsub.f32 2.0, %v1140_v0  ;;  %v1259_v31 = vmul.f32 %v3597_v26, %v1203_v2  ;;  %v1258_v53 = vmul.f32 %v3598_v59, %v1203_v2 }
 0x28a   : > { %v2248_v54 = vpop.eup %2247 }
 0x28b   : > { %v1204_v4 = vmul.f32 %v2246_v36, %v1172_v58  ;;  %v1141_v18 = vmul.f32 %v2248_v54, %v1065_v17  ;;  %1323 = vst [vmem:[%s3141_s15 + $0x178] sm:$0xff] %v1259_v31  ;;  %v1363_v35 = vpack.c.bf16 %v1259_v31, %v1257_v7  ;;  %1322 = vst [vmem:[%s3141_s15 + $0x170] sm:$0xff] %v1258_v53 }
 0x28c   : > { %v1362_v22 = vpack.c.bf16 %v1258_v53, %v1256_v45 }
 0x28d   : > { %v1173_v49 = vsub.f32 2.0, %v1141_v18  ;;  %1508 = vmatprep.mubr.bf16.mxu1 %v1363_v35  ;;  %v1261_v9 = vmul.f32 %v3599_v16, %v1204_v4  ;;  %v1260_v63 = vmul.f32 %v3600_v28, %v1204_v4 }
 0x28e   : > { %v2250_v48 = vpop.eup %2249 }
 0x28f   : > { %v1205_v3 = vmul.f32 %v2248_v54, %v1173_v49  ;;  %v1142_v11 = vmul.f32 %v2250_v48, %v1068_v41  ;;  %1325 = vst [vmem:[%s3141_s15 + $0x188] sm:$0xff] %v1261_v9  ;;  %1324 = vst [vmem:[%s3141_s15 + $0x180] sm:$0xff] %v1260_v63  ;;  %v3605_v41 = vld [vmem:[#allocation23_spill] sm:$0xff] }
 0x290   : > { %1509 = vmatmul.mubr.bf16.gmra.mxu1 %v1362_v22 }
 0x291   : > { %v1174_v43 = vsub.f32 2.0, %v1142_v11  ;;  %v1263_v12 = vmul.f32 %v3601_v6, %v1205_v3  ;;  %v1262_v47 = vmul.f32 %v3602_v23, %v1205_v3 }
 0x292   : > { %v2252_v14 = vpop.eup %2251 }
 0x293   : > { %v1206_v17 = vmul.f32 %v2250_v48, %v1174_v43  ;;  %v1143_v27 = vmul.f32 %v2252_v14, %v1071_v8  ;;  %1327 = vst [vmem:[%s3141_s15 + $0x198] sm:$0xff] %v1263_v12  ;;  %v1365_v60 = vpack.c.bf16 %v1263_v12, %v1261_v9  ;;  %1326 = vst [vmem:[%s3141_s15 + $0x190] sm:$0xff] %v1262_v47 }
 0x294   : > { %v1364_v62 = vpack.c.bf16 %v1262_v47, %v1260_v63 }
 0x295   : > { %v1175_v19 = vsub.f32 2.0, %v1143_v27  ;;  %1516 = vmatprep.mubr.bf16.mxu1 %v1365_v60  ;;  %v1265_v39 = vmul.f32 %v3603_v51, %v1206_v17  ;;  %v1264_v29 = vmul.f32 %v3604_v56, %v1206_v17 }
 0x297   : > { %v1207_v30 = vmul.f32 %v2252_v14, %v1175_v19  ;;  %1329 = vst [vmem:[%s3141_s15 + $0x1a8] sm:$0xff] %v1265_v39  ;;  %1328 = vst [vmem:[%s3141_s15 + $0x1a0] sm:$0xff] %v1264_v29  ;;  %v3310_v19 = vstv %s1549_s16 }
 0x298   : > { %1517 = vmatmul.mubr.bf16.gmra.mxu1 %v1364_v62 }
 0x299   : > { %v1267_v13 = vmul.f32 %v3605_v41, %v1207_v30  ;;  %v1266_v20 = vmul.f32 %v3606_v32, %v1207_v30  ;;  %v2266_v32 = vld [vmem:[%s2520_s20 + $0x18] sm:$0xff] }
 0x29b   : > { %1331 = vst [vmem:[%s3141_s15 + $0x1b8] sm:$0xff] %v1267_v13  ;;  %v1367_v61 = vpack.c.bf16 %v1267_v13, %v1265_v39  ;;  %1330 = vst [vmem:[%s3141_s15 + $0x1b0] sm:$0xff] %v1266_v20  ;;  %v1366_v42 = vpack.c.bf16 %v1266_v20, %v1264_v29 }
 0x29d   : > { %1524 = vmatprep.mubr.bf16.mxu1 %v1367_v61 }
 0x2a0   : > { %1525 = vmatmul.mubr.bf16.gmra.mxu1 %v1366_v42 }
 0x2c3   : > { %v1074_v21 = vpop.xlane.xlu0 %1073 }
 0x2c4   : > { %2253 = vrcp.f32 %v1074_v21 }
 0x2c7   : > { %v1077_v37 = vpop.xlane.xlu1 %1076 }
 0x2c8   : > { %2255 = vrcp.f32 %v1077_v37 }
 0x2cb   : > { %v990_v1 = vpop.xlane.xlu0 %989 }
 0x2cc   : > { %2257 = vrcp.f32 %v990_v1 }
 0x2cf   : > { %v993_v5 = vpop.xlane.xlu1 %992 }
 0x2d0   : > { %2259 = vrcp.f32 %v993_v5 }
 0x2d1   : > { %v2254_v8 = vpop.eup %2253 }
 0x2d2   : > { %v1144_v57 = vmul.f32 %v2254_v8, %v1074_v21 }
 0x2d3   : > { %v1080_v50 = vpop.xlane.xlu0 %1079 }
 0x2d4   : > { %v1176_v7 = vsub.f32 2.0, %v1144_v57  ;;  %2261 = vrcp.f32 %v1080_v50 }
 0x2d5   : > { %v2256_v45 = vpop.eup %2255 }
 0x2d6   : > { %v1208_v36 = vmul.f32 %v2254_v8, %v1176_v7  ;;  %v1145_v2 = vmul.f32 %v2256_v45, %v1077_v37 }
 0x2d7   : > { %v1083_v0 = vpop.xlane.xlu1 %1082 }
 0x2d8   : > { %v1177_v58 = vsub.f32 2.0, %v1145_v2  ;;  %2263 = vrcp.f32 %v1083_v0  ;;  %v1269_v26 = vmul.f32 %v3134_v40, %v1208_v36  ;;  %v1268_v31 = vmul.f32 %v3130_v52, %v1208_v36  ;;  %v2268_v36 = vld [vmem:[%s2520_s20 + $0x28] sm:$0xff] }
 0x2d9   : > { %v2258_v59 = vpop.eup %2257 }
 0x2da   : > { %v1209_v53 = vmul.f32 %v2256_v45, %v1177_v58  ;;  %v1116_v54 = vmul.f32 %v2258_v59, %v990_v1  ;;  %1333 = vst [vmem:[%s3141_s15 + $0x1c8] sm:$0xff] %v1269_v26  ;;  %1332 = vst [vmem:[%s3141_s15 + $0x1c0] sm:$0xff] %v1268_v31 }
 0x2dc   : > { %v1148_v4 = vsub.f32 2.0, %v1116_v54  ;;  %v1271_v18 = vmul.f32 %v3151_v44, %v1209_v53  ;;  %v1270_v35 = vmul.f32 %v3147_v25, %v1209_v53 }
 0x2dd   : > { %v2260_v22 = vpop.eup %2259 }
 0x2de   : > { %v1180_v49 = vmul.f32 %v2258_v59, %v1148_v4  ;;  %v1117_v16 = vmul.f32 %v2260_v22, %v993_v5  ;;  %1335 = vst [vmem:[%s3141_s15 + $0x1d8] sm:$0xff] %v1271_v18  ;;  %v1369_v9 = vpack.c.bf16 %v1271_v18, %v1269_v26  ;;  %1334 = vst [vmem:[%s3141_s15 + $0x1d0] sm:$0xff] %v1270_v35  ;;  %v2267_v5 = vld [vmem:[%s2520_s20 + $0x20] sm:$0xff]  ;;  %v2269_v59 = vld [vmem:[%s2520_s20 + $0x30] sm:$0xff] }
 0x2df   : > { %v1368_v52 = vpack.c.bf16 %v1270_v35, %v1268_v31 }
 0x2e0   : > { %v1212_v40 = vmul.f32 %v3161_v15, %v1180_v49  ;;  %v1149_v28 = vsub.f32 2.0, %v1117_v16  ;;  %1532 = vmatprep.mubr.bf16.mxu1 %v1369_v9  ;;  %v1213_v63 = vmul.f32 %v3163_v33, %v1180_v49 }
 0x2e1   : > { %v2262_v48 = vpop.eup %2261  ;;  %1533 = vmatmul.mubr.bf16.gmra.mxu1 %v1368_v52 }
 0x2e2   : > { %1276 = vst [vmem:[%s3141_s15] sm:$0xff] %v1212_v40  ;;  %v1181_v25 = vmul.f32 %v2260_v22, %v1149_v28  ;;  %v1146_v44 = vmul.f32 %v2262_v48, %v1080_v50  ;;  %1277 = vst [vmem:[%s3141_s15 + $0x8] sm:$0xff] %v1213_v63  ;;  %v2270_v22 = vld [vmem:[%s2520_s20 + $0x38] sm:$0xff]  ;;  %v2271_v28 = vld [vmem:[%s2520_s20 + $0x40] sm:$0xff] }
 0x2e4   : > { %v1214_v3 = vmul.f32 %v3173_v34, %v1181_v25  ;;  %v1178_v11 = vsub.f32 2.0, %v1146_v44  ;;  %v1215_v43 = vmul.f32 %v3175_v46, %v1181_v25 }
 0x2e5   : > { %v2264_v6 = vpop.eup %2263 }
 0x2e6   : > { %1278 = vst [vmem:[%s3141_s15 + $0x10] sm:$0xff] %v1214_v3  ;;  %v1340_v15 = vpack.c.bf16 %v1214_v3, %v1212_v40  ;;  %v1210_v12 = vmul.f32 %v2262_v48, %v1178_v11  ;;  %v1147_v33 = vmul.f32 %v2264_v6, %v1083_v0  ;;  %1279 = vst [vmem:[%s3141_s15 + $0x18] sm:$0xff] %v1215_v43  ;;  %v2272_v11 = vld [vmem:[%s2520_s20 + $0x48] sm:$0xff] }
 0x2e7   : > { %v1341_v23 = vpack.c.bf16 %v1215_v43, %v1213_v63 }
 0x2e8   : > { %v1272_v47 = vmul.f32 %v3184_v55, %v1210_v12  ;;  %v1273_v14 = vmul.f32 %v3186_v38, %v1210_v12  ;;  %v1179_v17 = vsub.f32 2.0, %v1147_v33 }
 0x2e9   : > { %1420 = vmatprep.mubr.bf16.mxu0 %v1341_v23  ;;  %v2273_v23 = vld [vmem:[%s2520_s20 + $0x50] sm:$0xff] }
 0x2ea   : > { %1421 = vmatmul.mubr.bf16.vlgmr.msra.gmra.mxu0 %v1340_v15  ;;  %1336 = vst [vmem:[%s3141_s15 + $0x1e0] sm:$0xff] %v1272_v47  ;;  %1337 = vst [vmem:[%s3141_s15 + $0x1e8] sm:$0xff] %v1273_v14  ;;  %v1211_v34 = vmul.f32 %v2264_v6, %v1179_v17 }
 0x2ec   : > { %v1274_v46 = vmul.f32 %v3195_v24, %v1211_v34  ;;  %v1275_v27 = vmul.f32 %v3197_v10, %v1211_v34  ;;  %v2265_v10 = vld [vmem:[%s2520_s20 + $0x10] sm:$0xff] }
 0x2ee   : > { %1338 = vst [vmem:[%s3141_s15 + $0x1f0] sm:$0xff] %v1274_v46  ;;  %1339 = vst [vmem:[%s3141_s15 + $0x1f8] sm:$0xff] %v1275_v27  ;;  %v1371_v60 = vpack.c.bf16 %v1275_v27, %v1273_v14  ;;  %v1370_v62 = vpack.c.bf16 %v1274_v46, %v1272_v47  ;;  %v2274_v27 = vld [vmem:[%s2520_s20 + $0x58] sm:$0xff]  ;;  %s2303_s15 = scalar_lea.vmem %s2302_s13, 16384 }
 0x2ef   : > { %p2305_p2 = scmp.lt.s32.totalorder %s2303_s15, %s2297_s9 }
 0x2f0   : > { %1540 = vmatprep.mubr.bf16.mxu1 %v1371_v60 }
 0x2f1   : > { %1541 = vmatmul.mubr.bf16.gmra.mxu1 %v1370_v62  ;;  %p2306_p3 = por %p2305_p2, %p2304_p1 }
 0x2f3   : > { %p2307_p5 = pnand %p2306_p3, %p2300_p0 }
 0x2ff   : > { %v1902_v55 = vpop.f32.mrf.mxu1 }
 0x301   : > { %v1903_v38 = vpop.f32.mrf.mxu1 }
 0x302   : > { %v1904_v51 = vadd.f32 %v1903_v38, %v1902_v55 }
 0x303   : > { %v1905_v39 = vpop.f32.mrf.mxu1 }
 0x304   : > { %v1553_v24 = vmul.f32 %v1904_v51, %v3310_v19 }
 0x305   : > { %v1906_v56 = vpop.f32.mrf.mxu1 }
 0x306   : > { %v1585_v29 = vadd.f32 %v2265_v10, %v1553_v24  ;;  %v1907_v30 = vadd.f32 %v1906_v56, %v1905_v39  ;;  %v2275_v39 = vld [vmem:[%s2520_s20 + $0x60] sm:$0xff] }
 0x308   : > { %1617 = vst.msk [vmem:[%s3315_s18 + $0x10] sm:$0xff] %vm458_vm0, %v1585_v29  ;;  %v1554_v41 = vmul.f32 %v1907_v30, %v3310_v19  ;;  %v1908_v13 = vpop.f32.mrf.mxu1 }
 0x30a   : > { %v1586_v20 = vadd.f32 %v2266_v32, %v1554_v41  ;;  %v1909_v61 = vpop.f32.mrf.mxu1  ;;  %v2276_v41 = vld [vmem:[%s2520_s20 + $0x68] sm:$0xff] }
 0x30b   : > { %v1910_v42 = vadd.f32 %v1909_v61, %v1908_v13 }
 0x30c   : > { %1618 = vst.msk [vmem:[%s3315_s18 + $0x18] sm:$0xff] %vm458_vm0, %v1586_v20  ;;  %v1911_v21 = vpop.f32.mrf.mxu1 }
 0x30d   : > { %v1555_v37 = vmul.f32 %v1910_v42, %v3310_v19 }
 0x30e   : > { %v1912_v1 = vpop.f32.mrf.mxu1 }
 0x30f   : > { %v1587_v8 = vadd.f32 %v2267_v5, %v1555_v37  ;;  %v1913_v57 = vadd.f32 %v1912_v1, %v1911_v21  ;;  %v2277_v21 = vld [vmem:[%s2520_s20 + $0x70] sm:$0xff] }
 0x310   : > { %v1914_v50 = vpop.f32.mrf.mxu1 }
 0x311   : > { %1619 = vst.msk [vmem:[%s3315_s18 + $0x20] sm:$0xff] %vm458_vm0, %v1587_v8  ;;  %v1556_v7 = vmul.f32 %v1913_v57, %v3310_v19 }
 0x312   : > { %v1915_v45 = vpop.f32.mrf.mxu1 }
 0x313   : > { %v1588_v2 = vadd.f32 %v2268_v36, %v1556_v7  ;;  %v1916_v0 = vadd.f32 %v1915_v45, %v1914_v50  ;;  %v2278_v50 = vld [vmem:[%s2520_s20 + $0x78] sm:$0xff] }
 0x314   : > { %v1917_v58 = vpop.f32.mrf.mxu1 }
 0x315   : > { %1620 = vst.msk [vmem:[%s3315_s18 + $0x28] sm:$0xff] %vm458_vm0, %v1588_v2  ;;  %v1557_v26 = vmul.f32 %v1916_v0, %v3310_v19 }
 0x316   : > { %v1918_v31 = vpop.f32.mrf.mxu1 }
 0x317   : > { %v1589_v53 = vadd.f32 %v2269_v59, %v1557_v26  ;;  %v1919_v54 = vadd.f32 %v1918_v31, %v1917_v58  ;;  %v2279_v58 = vld [vmem:[%s2520_s20 + $0x80] sm:$0xff] }
 0x318   : > { %v1920_v4 = vpop.f32.mrf.mxu1 }
 0x319   : > { %1621 = vst.msk [vmem:[%s3315_s18 + $0x30] sm:$0xff] %vm458_vm0, %v1589_v53  ;;  %v1558_v18 = vmul.f32 %v1919_v54, %v3310_v19 }
 0x31a   : > { %v1921_v35 = vpop.f32.mrf.mxu1 }
 0x31b   : > { %v1590_v49 = vadd.f32 %v2270_v22, %v1558_v18  ;;  %v1922_v16 = vadd.f32 %v1921_v35, %v1920_v4  ;;  %v2280_v4 = vld [vmem:[%s2520_s20 + $0x88] sm:$0xff] }
 0x31c   : > { %v1923_v9 = vpop.f32.mrf.mxu1 }
 0x31d   : > { %1622 = vst.msk [vmem:[%s3315_s18 + $0x38] sm:$0xff] %vm458_vm0, %v1590_v49  ;;  %v1559_v52 = vmul.f32 %v1922_v16, %v3310_v19 }
 0x31e   : > { %v1924_v40 = vpop.f32.mrf.mxu1 }
 0x31f   : > { %v1591_v63 = vadd.f32 %v2271_v28, %v1559_v52  ;;  %v1925_v48 = vadd.f32 %v1924_v40, %v1923_v9 }
 0x320   : > { %v1926_v25 = vpop.f32.mrf.mxu1 }
 0x321   : > { %1623 = vst.msk [vmem:[%s3315_s18 + $0x40] sm:$0xff] %vm458_vm0, %v1591_v63  ;;  %v1560_v44 = vmul.f32 %v1925_v48, %v3310_v19 }
 0x322   : > { %v1927_v3 = vpop.f32.mrf.mxu1 }
 0x323   : > { %v1592_v43 = vadd.f32 %v2272_v11, %v1560_v44  ;;  %v1928_v6 = vadd.f32 %v1927_v3, %v1926_v25 }
 0x324   : > { %v1929_v15 = vpop.f32.mrf.mxu1 }
 0x325   : > { %1624 = vst.msk [vmem:[%s3315_s18 + $0x48] sm:$0xff] %vm458_vm0, %v1592_v43  ;;  %v1561_v12 = vmul.f32 %v1928_v6, %v3310_v19 }
 0x326   : > { %v1930_v33 = vpop.f32.mrf.mxu1 }
 0x327   : > { %v1593_v47 = vadd.f32 %v2273_v23, %v1561_v12  ;;  %v1931_v14 = vadd.f32 %v1930_v33, %v1929_v15 }
 0x328   : > { %v1932_v17 = vpop.f32.mrf.mxu1 }
 0x329   : > { %1625 = vst.msk [vmem:[%s3315_s18 + $0x50] sm:$0xff] %vm458_vm0, %v1593_v47  ;;  %v1562_v34 = vmul.f32 %v1931_v14, %v3310_v19 }
 0x32a   : > { %v1933_v46 = vpop.f32.mrf.mxu1 }
 0x32b   : > { %v1594_v60 = vadd.f32 %v2274_v27, %v1562_v34  ;;  %v1934_v62 = vadd.f32 %v1933_v46, %v1932_v17 }
 0x32c   : > { %v1935_v55 = vpop.f32.mrf.mxu1 }
 0x32d   : > { %1626 = vst.msk [vmem:[%s3315_s18 + $0x58] sm:$0xff] %vm458_vm0, %v1594_v60  ;;  %v1563_v38 = vmul.f32 %v1934_v62, %v3310_v19 }
 0x32e   : > { %v1936_v51 = vpop.f32.mrf.mxu1 }
 0x32f   : > { %v1595_v24 = vadd.f32 %v2275_v39, %v1563_v38  ;;  %v1937_v56 = vadd.f32 %v1936_v51, %v1935_v55 }
 0x330   : > { %v1938_v10 = vpop.f32.mrf.mxu1 }
 0x331   : > { %1627 = vst.msk [vmem:[%s3315_s18 + $0x60] sm:$0xff] %vm458_vm0, %v1595_v24  ;;  %v1564_v29 = vmul.f32 %v1937_v56, %v3310_v19 }
 0x332   : > { %v1939_v30 = vpop.f32.mrf.mxu1 }
 0x333   : > { %v1596_v13 = vadd.f32 %v2276_v41, %v1564_v29  ;;  %v1940_v32 = vadd.f32 %v1939_v30, %v1938_v10 }
 0x334   : > { %v1941_v20 = vpop.f32.mrf.mxu1 }
 0x335   : > { %1628 = vst.msk [vmem:[%s3315_s18 + $0x68] sm:$0xff] %vm458_vm0, %v1596_v13  ;;  %v1565_v61 = vmul.f32 %v1940_v32, %v3310_v19 }
 0x336   : > { %v1942_v42 = vpop.f32.mrf.mxu1 }
 0x337   : > { %v1597_v37 = vadd.f32 %v2277_v21, %v1565_v61  ;;  %v1943_v1 = vadd.f32 %v1942_v42, %v1941_v20 }
 0x338   : > { %v1944_v5 = vpop.f32.mrf.mxu1 }
 0x339   : > { %1629 = vst.msk [vmem:[%s3315_s18 + $0x70] sm:$0xff] %vm458_vm0, %v1597_v37  ;;  %v1566_v8 = vmul.f32 %v1943_v1, %v3310_v19 }
 0x33a   : > { %v1945_v57 = vpop.f32.mrf.mxu1 }
 0x33b   : > { %v1598_v7 = vadd.f32 %v2278_v50, %v1566_v8  ;;  %v1946_v45 = vadd.f32 %v1945_v57, %v1944_v5 }
 0x33c   : > { %v1947_v36 = vpop.f32.mrf.mxu1 }
 0x33d   : > { %1630 = vst.msk [vmem:[%s3315_s18 + $0x78] sm:$0xff] %vm458_vm0, %v1598_v7  ;;  %v1567_v2 = vmul.f32 %v1946_v45, %v3310_v19 }
 0x33e   : > { %v1948_v0 = vpop.f32.mrf.mxu1 }
 0x33f   : > { %v1599_v26 = vadd.f32 %v2279_v58, %v1567_v2  ;;  %v1949_v31 = vadd.f32 %v1948_v0, %v1947_v36 }
 0x340   : > { %v1950_v59 = vpop.f32.mrf.mxu1 }
 0x341   : > { %1631 = vst.msk [vmem:[%s3315_s18 + $0x80] sm:$0xff] %vm458_vm0, %v1599_v26  ;;  %v1568_v53 = vmul.f32 %v1949_v31, %v3310_v19 }
 0x342   : > { %v1951_v54 = vpop.f32.mrf.mxu1 }
 0x343   : > { %v1600_v18 = vadd.f32 %v2280_v4, %v1568_v53  ;;  %v1952_v35 = vadd.f32 %v1951_v54, %v1950_v59 }
 0x344   : > { %v1953_v22 = vpop.f32.mrf.mxu1 }
 0x345   : > { %1632 = vst.msk [vmem:[%s3315_s18 + $0x88] sm:$0xff] %vm458_vm0, %v1600_v18  ;;  %v1569_v49 = vmul.f32 %v1952_v35, %v3310_v19 }
 0x346   : > { %2310 = shalt.err (!%p2307_p5)
}
 0x347   : > { %s2311_s16 = scalar_lea.hbm %s3382_s29, 8192  ;;  %s2315_s22 = scalar_lea.hbm %s3535_s6, 16384 }
 0x348   : > { %p2312_p6 = scmp.ne.s32.totalorder %s3382_s29, %s2311_s16  ;;  %p2316_p10 = scmp.lt.s32.totalorder %s3382_s29, %s3535_s6 }
 0x349   : > { %p2317_p11 = scmp.lt.s32.totalorder %s2315_s22, %s2311_s16 }
 0x34a   : > { %p2313_p7 = pnand %p2312_p6, %p2490_p4 }
 0x34b   : > { %p2318_p12 = por %p2317_p11, %p2316_p10 }
 0x34c   : > { %p2314_p9 = pneg %p2313_p7 }
 0x34e   : > { %p2319_p13 = pnand %p2318_p12, %p2314_p9 }
 0x350   : > { %2322 = shalt.err (!%p2319_p13)
}
 0x351   : > { %s2407_s9 = smov 256   ;;  %s2408_s13 = smov 16   ;;  %v1954_v16 = vpop.f32.mrf.mxu1  ;;  %v2281_v9 = vld [vmem:[%s2520_s20 + $0x90] sm:$0xff]  ;;  %v2282_v25 = vld [vmem:[%s2520_s20 + $0x98] sm:$0xff]  ;;  %v2283_v15 = vld [vmem:[%s2520_s20 + $0xa0] sm:$0xff] }
 0x352   : > { %2009 = dma.vmem_to_hbm [thread:$0]  (%p2490_p4), %s3384_s21, 8192, %s3382_s29, %s1653_s7, %s2407_s9, %s2407_s9, %s2408_s13   ;;  %v1601_v52 = vadd.f32 %v2281_v9, %v1569_v49  ;;  %v1955_v40 = vadd.f32 %v1954_v16, %v1953_v22 }
 0x353   : > { %v1956_v28 = vpop.f32.mrf.mxu1  ;;  %v2284_v17 = vld [vmem:[%s2520_s20 + $0xa8] sm:$0xff]  ;;  %v2285_v55 = vld [vmem:[%s2520_s20 + $0xb0] sm:$0xff]  ;;  %v2286_v10 = vld [vmem:[%s2520_s20 + $0xb8] sm:$0xff]  ;;  %s1878_s21 = sshll.u32 %s2395_s26, 12  ;;  %s1668_s29 = sshll.u32 %s3315_s18, 4  ;;  %s3479_s29 = int_to_ptr.vmem [resolvable:$true] %s1668_s29 }
 0x354   : > { %1633 = vst.msk [vmem:[%s3315_s18 + $0x90] sm:$0xff] %vm458_vm0, %v1601_v52  ;;  %v1570_v63 = vmul.f32 %v1955_v40, %v3310_v19  ;;  %v2287_v20 = vld [vmem:[%s2520_s20 + $0xc0] sm:$0xff]  ;;  %v2288_v5 = vld [vmem:[%s2520_s20 + $0xc8] sm:$0xff]  ;;  %v2289_v36 = vld [vmem:[%s2520_s20 + $0xd0] sm:$0xff]  ;;  %s3477_s16 = scalar_lea.hbm %s3534_s5, %s1878_s21  ;;  %s1648_s26 = scalar_lea.sflag [#allocation4], %s3118_s12 }
 0x355   : > { %v1957_v48 = vpop.f32.mrf.mxu1  ;;  %v2290_v26 = vld [vmem:[%s2520_s20 + $0xd8] sm:$0xff]  ;;  %v2291_v22 = vld [vmem:[%s2520_s20 + $0xe0] sm:$0xff]  ;;  %s2323_s17 = scalar_lea.vmem %s3479_s29, 4096  ;;  %s2409_s19 = smov [#allocation3]  }
 0x356   : > { %v1602_v44 = vadd.f32 %v2282_v25, %v1570_v63  ;;  %v1958_v3 = vadd.f32 %v1957_v48, %v1956_v28  ;;  %v2292_v28 = vld [vmem:[%s2520_s20 + $0xe8] sm:$0xff]  ;;  %p2324_p0 = scmp.ne.s32.totalorder %s3479_s29, %s2323_s17  ;;  %s2327_s22 = sshll.u32 %s2409_s19, 4  ;;  %s2328_s22 = int_to_ptr.vmem [resolvable:$false] %s2327_s22 }
 0x357   : > { %v1959_v11 = vpop.f32.mrf.mxu1  ;;  %s2329_s4 = scalar_lea.vmem %s2328_s22, 8192  ;;  %p2330_p3 = scmp.lt.s32.totalorder %s3479_s29, %s2328_s22 }
 0x358   : > { %1634 = vst.msk [vmem:[%s3315_s18 + $0x98] sm:$0xff] %vm458_vm0, %v1602_v44  ;;  %v1571_v43 = vmul.f32 %v1958_v3, %v3310_v19  ;;  %p2325_p1 = pnand %p2324_p0, %p2490_p4  ;;  %p2331_p5 = scmp.lt.s32.totalorder %s2329_s4, %s2323_s17 }
 0x359   : > { %v1960_v6 = vpop.f32.mrf.mxu1 }
 0x35a   : > { %v1603_v12 = vadd.f32 %v2283_v15, %v1571_v43  ;;  %v1961_v33 = vadd.f32 %v1960_v6, %v1959_v11  ;;  %v2293_v11 = vld [vmem:[%s2520_s20] sm:$0xff]  ;;  %p2326_p2 = pneg %p2325_p1  ;;  %p2332_p6 = por %p2331_p5, %p2330_p3 }
 0x35b   : > { %v1962_v23 = vpop.f32.mrf.mxu1 }
 0x35c   : > { %1635 = vst.msk [vmem:[%s3315_s18 + $0xa0] sm:$0xff] %vm458_vm0, %v1603_v12  ;;  %v1572_v47 = vmul.f32 %v1961_v33, %v3310_v19  ;;  %p2333_p7 = pnand %p2332_p6, %p2326_p2 }
 0x35d   : > { %v1963_v14 = vpop.f32.mrf.mxu1 }
 0x35e   : > { %v1604_v34 = vadd.f32 %v2284_v17, %v1572_v47  ;;  %v1964_v46 = vadd.f32 %v1963_v14, %v1962_v23  ;;  %v2294_v23 = vld [vmem:[%s2520_s20 + $0x8] sm:$0xff] }
 0x35f   : > { %v1965_v27 = vpop.f32.mrf.mxu1 }
 0x360   : > { %1636 = vst.msk [vmem:[%s3315_s18 + $0xa8] sm:$0xff] %vm458_vm0, %v1604_v34  ;;  %v1573_v60 = vmul.f32 %v1964_v46, %v3310_v19 }
 0x361   : > { %v1966_v62 = vpop.f32.mrf.mxu1 }
 0x362   : > { %v1605_v38 = vadd.f32 %v2285_v55, %v1573_v60  ;;  %v1967_v51 = vadd.f32 %v1966_v62, %v1965_v27  ;;  %v2295_v27 = vld [vmem:[%s2520_s20 + $0xf0] sm:$0xff] }
 0x363   : > { %v1968_v39 = vpop.f32.mrf.mxu1 }
 0x364   : > { %1637 = vst.msk [vmem:[%s3315_s18 + $0xb0] sm:$0xff] %vm458_vm0, %v1605_v38  ;;  %v1574_v24 = vmul.f32 %v1967_v51, %v3310_v19  ;;  %v2296_v38 = vld [vmem:[%s2520_s20 + $0xf8] sm:$0xff] }
 0x365   : > { %v1969_v56 = vpop.f32.mrf.mxu1 }
 0x366   : > { %v1606_v29 = vadd.f32 %v2286_v10, %v1574_v24  ;;  %v1970_v30 = vadd.f32 %v1969_v56, %v1968_v39 }
 0x367   : > { %v1971_v41 = vpop.f32.mrf.mxu1 }
 0x368   : > { %1638 = vst.msk [vmem:[%s3315_s18 + $0xb8] sm:$0xff] %vm458_vm0, %v1606_v29  ;;  %v1575_v13 = vmul.f32 %v1970_v30, %v3310_v19 }
 0x369   : > { %v1972_v32 = vpop.f32.mrf.mxu1 }
 0x36a   : > { %v1607_v61 = vadd.f32 %v2287_v20, %v1575_v13  ;;  %v1973_v42 = vadd.f32 %v1972_v32, %v1971_v41 }
 0x36b   : > { %v1974_v21 = vpop.f32.mrf.mxu1 }
 0x36c   : > { %1639 = vst.msk [vmem:[%s3315_s18 + $0xc0] sm:$0xff] %vm458_vm0, %v1607_v61  ;;  %v1576_v37 = vmul.f32 %v1973_v42, %v3310_v19 }
 0x36d   : > { %v1975_v1 = vpop.f32.mrf.mxu1 }
 0x36e   : > { %v1608_v8 = vadd.f32 %v2288_v5, %v1576_v37  ;;  %v1976_v57 = vadd.f32 %v1975_v1, %v1974_v21 }
 0x36f   : > { %v1977_v50 = vpop.f32.mrf.mxu1 }
 0x370   : > { %1640 = vst.msk [vmem:[%s3315_s18 + $0xc8] sm:$0xff] %vm458_vm0, %v1608_v8  ;;  %v1577_v7 = vmul.f32 %v1976_v57, %v3310_v19 }
 0x371   : > { %v1978_v45 = vpop.f32.mrf.mxu1 }
 0x372   : > { %v1609_v2 = vadd.f32 %v2289_v36, %v1577_v7  ;;  %v1979_v0 = vadd.f32 %v1978_v45, %v1977_v50 }
 0x374   : > { %1641 = vst.msk [vmem:[%s3315_s18 + $0xd0] sm:$0xff] %vm458_vm0, %v1609_v2  ;;  %v1578_v58 = vmul.f32 %v1979_v0, %v3310_v19 }
 0x376   : > { %v1610_v31 = vadd.f32 %v2290_v26, %v1578_v58 }
 0x378   : > { %1642 = vst.msk [vmem:[%s3315_s18 + $0xd8] sm:$0xff] %vm458_vm0, %v1610_v31 }
 0x3a1   : > { %v1980_v59 = vpop.f32.mrf.mxu1 }
 0x3a3   : > { %v1981_v53 = vpop.f32.mrf.mxu1 }
 0x3a4   : > { %v1982_v54 = vadd.f32 %v1981_v53, %v1980_v59 }
 0x3a5   : > { %v1983_v4 = vpop.f32.mrf.mxu1 }
 0x3a6   : > { %v1579_v18 = vmul.f32 %v1982_v54, %v3310_v19 }
 0x3a7   : > { %v1984_v35 = vpop.f32.mrf.mxu1 }
 0x3a8   : > { %v1611_v49 = vadd.f32 %v2291_v22, %v1579_v18  ;;  %v1985_v16 = vadd.f32 %v1984_v35, %v1983_v4 }
 0x3aa   : > { %v1896_v9 = vpop.f32.mrf.mxu0  ;;  %1643 = vst.msk [vmem:[%s3315_s18 + $0xe0] sm:$0xff] %vm458_vm0, %v1611_v49  ;;  %v1580_v52 = vmul.f32 %v1985_v16, %v3310_v19 }
 0x3ac   : > { %v1897_v40 = vpop.f32.mrf.mxu0  ;;  %v1612_v63 = vadd.f32 %v2292_v28, %v1580_v52 }
 0x3ad   : > { %v1898_v48 = vadd.f32 %v1897_v40, %v1896_v9 }
 0x3ae   : > { %v1899_v25 = vpop.f32.mrf.mxu0  ;;  %1644 = vst.msk [vmem:[%s3315_s18 + $0xe8] sm:$0xff] %vm458_vm0, %v1612_v63 }
 0x3af   : > { %v1551_v44 = vmul.f32 %v1898_v48, %v3310_v19 }
 0x3b0   : > { %v1900_v3 = vpop.f32.mrf.mxu0 }
 0x3b1   : > { %v1583_v43 = vadd.f32 %v2293_v11, %v1551_v44  ;;  %v1901_v6 = vadd.f32 %v1900_v3, %v1899_v25  ;;  %v1986_v15 = vpop.f32.mrf.mxu1 }
 0x3b3   : > { %1615 = vst.msk [vmem:[%s3315_s18] sm:$0xff] %vm458_vm0, %v1583_v43  ;;  %v1552_v12 = vmul.f32 %v1901_v6, %v3310_v19  ;;  %v1987_v33 = vpop.f32.mrf.mxu1 }
 0x3b4   : > { %v1988_v14 = vadd.f32 %v1987_v33, %v1986_v15 }
 0x3b5   : > { %v1584_v47 = vadd.f32 %v2294_v23, %v1552_v12  ;;  %v1989_v17 = vpop.f32.mrf.mxu1 }
 0x3b6   : > { %v1581_v34 = vmul.f32 %v1988_v14, %v3310_v19 }
 0x3b7   : > { %1616 = vst.msk [vmem:[%s3315_s18 + $0x8] sm:$0xff] %vm458_vm0, %v1584_v47  ;;  %v1990_v46 = vpop.f32.mrf.mxu1 }
 0x3b8   : > { %v1613_v60 = vadd.f32 %v2295_v27, %v1581_v34  ;;  %v1991_v62 = vadd.f32 %v1990_v46, %v1989_v17 }
 0x3ba   : > { %1645 = vst.msk [vmem:[%s3315_s18 + $0xf0] sm:$0xff] %vm458_vm0, %v1613_v60  ;;  %v1582_v55 = vmul.f32 %v1991_v62, %v3310_v19 }
 0x3bc   : > { %v1614_v51 = vadd.f32 %v2296_v38, %v1582_v55 }
 0x3be   : > { %1646 = vst.msk [vmem:[%s3315_s18 + $0xf8] sm:$0xff] %vm458_vm0, %v1614_v51 }
 0x3bf   : > { %2336 = shalt.err (!%p2333_p7)
}
 0x3c0   : > { %s2337_s20 = scalar_lea.hbm %s3477_s16, 4096  ;;  %s2341_s9 = scalar_lea.hbm %s3534_s5, 8192 }
 0x3c1   : > { %p2338_p9 = scmp.ne.s32.totalorder %s3477_s16, %s2337_s20  ;;  %p2342_p12 = scmp.lt.s32.totalorder %s3477_s16, %s3534_s5 }
 0x3c2   : > { %p2343_p13 = scmp.lt.s32.totalorder %s2341_s9, %s2337_s20 }
 0x3c3   : > { %p2339_p10 = pnand %p2338_p9, %p2490_p4 }
 0x3c4   : > { %p2344_p0 = por %p2343_p13, %p2342_p12 }
 0x3c5   : > { %p2340_p11 = pneg %p2339_p10 }
 0x3c7   : > { %p2345_p1 = pnand %p2344_p0, %p2340_p11 }
 0x3c9   : > { %2348 = shalt.err (!%p2345_p1)
}
 0x3ca   : > { %s2410_s7 = smov 128   ;;  %s2411_s15 = smov 8  }
 0x3cb   : > { %2008 = dma.vmem_to_hbm [thread:$0]  (%p2490_p4), %s3479_s29, 4096, %s3477_s16, %s1648_s26, %s2410_s7, %s2410_s7, %s2411_s15  }
 0x3cc PF: > { %p2019_p2 = scmp.ge.s32.totalorder %s2403_s28, 2  ;;  %s1702_s17 = sand.u32 1, %s2383_s23  }
 0x3cd   : > { %s1703_s19 = scalar_lea.sflag [#allocation4], %s1702_s17 }
 0x3ce   : > { %p2013_p3 = pnand %p2019_p2, %p2497_p8 }
 0x3d0   : > { %p2014_p5 = pneg %p2013_p3 }
 0x3d2   : > { %2374 = dma.done.wait (%p2014_p5), %s1703_s19, 4096  }
 0x3d3   : > { %2376 = vsyncadd (%p2014_p5), %s1703_s19, 4294963200  ;;  %s1712_s22 = scalar_lea.sflag [#allocation6], %s1702_s17 }
 0x3d4   : > { %2378 = dma.done.wait (%p2014_p5), %s1712_s22, 8192  }
 0x3d5   : > { %2380 = vsyncadd (%p2014_p5), %s1712_s22, 4294959104  ;;  %s24_s28 = sadd.s32 1, %s2403_s28   ;;  %s3607_s23 = smov %s2387_s24 }
 0x3d6   : > { %p21_p6 = scmp.ge.s32.totalorder %s24_s28, 4   ;;  %s3608_s24 = smov %s2391_s25 }
 0x3d7   : > { %s3609_s25 = smov %s2503_s11  ;;  %s3610_s26 = smov %s2399_s27 }
 0x3d8   : > { %s3611_s27 = smov %s3613_s30  ;;  %23 = sbr.rel (!%p21_p6) target bundleno = 8 (0x8), region = 101 }
 0x3dd   :  { %1717 = vsyncpa [#allocation4], 1 }
 0x3de   :  { %1719 = vsyncpa [#allocation4 + $0x1], 1 }
 0x3df   :  { %1720 = vsyncpa [#allocation6], 1 }
 0x3e0   :  { %1722 = vsyncpa [#allocation6 + $0x1], 1 }

</bundles_post_ra>
